<compile_context>
chip_gen: v7x
topology: tpu7x:2x2x1
jax: 0.10.0
libtpu: 0.0.40
codegen_flags: <defaults>
</compile_context>

<pallas_src>
import functools

import jax
import jax.numpy as jnp
from jax.experimental import pallas as pl
from jax.experimental.pallas import tpu as pltpu

# ---------------------------- model configuration ----------------------------
NUM_FEATURES = 768        # num_features (module default)
HIDDEN_DIM = 256          # self.hidden_dim
NUM_CLASSES = 9           # num_classes (module default)
CLASS_PAD = 128           # lane-dense padded class dim used inside the kernel
EDGE_FEATURE_DIM = 100    # edge_feature_dim (module default)
NUM_EDGE_TYPES = 40       # dependency-relation vocabulary (conv-internal)
DROPOUT_P = 0.4

NUM_NODES = 64            # small example graph
NUM_EDGES = 256


# ------------------------------- Pallas kernel --------------------------------
def _dropout(x, p):
    """Seeded TPU-PRNG dropout matching F.dropout scaling (1/(1-p) on kept)."""
    bits = pltpu.bitcast(pltpu.prng_random_bits(x.shape), jnp.int32)
    r = bits & jnp.int32(0x7FFFFFFF)                    # uniform in [0, 2^31)
    keep = r >= jnp.int32(int(p * (1 << 31)))
    return jnp.where(keep, x * (1.0 / (1.0 - p)), 0.0)


def _argcn_fused_kernel(seed_ref, x_ref, a_ref, w1_ref, b1_ref, w2_ref, b2_ref,
                        o_ref, *, p_drop, training):
    """Both ARGCN_dep_distance_conv layers + dropout + relu, fused (one graph)."""
    if training:
        pltpu.prng_seed(seed_ref[0] + pl.program_id(0))

    x = x_ref[0]                                        # (N, F)   bf16
    a1 = a_ref[0, 0]                                    # (N, N)   bf16
    a2 = a_ref[0, 1]                                    # (N, N)   bf16

    # ---- conv1: one GEMM for [W1 | Wroot1] -> (N, 2H) f32 --------------------
    hc = jnp.dot(x, w1_ref[...], preferred_element_type=jnp.float32)
    hdim = hc.shape[1] // 2                             # 256 (128-aligned slice)
    h1 = jnp.dot(a1, hc[:, :hdim].astype(jnp.bfloat16),
                 preferred_element_type=jnp.float32)
    h1 = h1 + hc[:, hdim:] + b1_ref[...]
    if training:                                        # F.dropout(p=0.4)
        h1 = _dropout(h1, p_drop)
    h1 = jnp.maximum(h1, 0.0)                           # F.relu

    # ---- conv2: one GEMM for [W2 | Wroot2] -> (N, 2*CLASS_PAD) f32 ------------
    gc = jnp.dot(h1.astype(jnp.bfloat16), w2_ref[...],
                 preferred_element_type=jnp.float32)
    cdim = gc.shape[1] // 2                             # 128 (128-aligned slice)
    out = jnp.dot(a2, gc[:, :cdim].astype(jnp.bfloat16),
                  preferred_element_type=jnp.float32)
    out = out + gc[:, cdim:] + b2_ref[...]
    if training:                                        # F.dropout(p=0.4)
        out = _dropout(out, p_drop)
    o_ref[0] = jnp.maximum(out, 0.0)                    # F.relu (lane-dense store)


def argcn_fused(x, a, w1c, b1, w2c, b2, seed, *, training):
    """One pallas_call for the whole 2-layer network over a batch of graphs.

    x:   (B, N, F)        bf16
    a:   (B, 2, N, N)     bf16   (stacked attention adjacency for conv1/conv2)
    w1c: (F, 2H) bf16,  b1: (1, H) f32
    w2c: (H, 2*CLASS_PAD) bf16,  b2: (1, CLASS_PAD) f32
    returns (B, N, CLASS_PAD) f32
    """
    b, n, f = x.shape
    h2 = w1c.shape[1]
    c2 = w2c.shape[1]
    hdim, cdim = h2 // 2, c2 // 2

    kernel = functools.partial(_argcn_fused_kernel,
                               p_drop=DROPOUT_P, training=training)
    return pl.pallas_call(
        kernel,
        out_shape=jax.ShapeDtypeStruct((b, n, cdim), jnp.float32),
        grid=(b,),
        in_specs=[
            pl.BlockSpec(memory_space=pltpu.MemorySpace.SMEM),        # seed
            pl.BlockSpec((1, n, f), lambda i: (i, 0, 0)),             # x (per graph)
            pl.BlockSpec((1, 2, n, n), lambda i: (i, 0, 0, 0)),       # A1/A2
            pl.BlockSpec((f, h2), lambda i: (0, 0)),                  # weights stay
            pl.BlockSpec((1, hdim), lambda i: (0, 0)),                #  resident in
            pl.BlockSpec((h2 // 2, c2), lambda i: (0, 0)),            #  VMEM across
            pl.BlockSpec((1, cdim), lambda i: (0, 0)),                #  grid steps
        ],
        out_specs=pl.BlockSpec((1, n, cdim), lambda i: (i, 0, 0)),
        compiler_params=pltpu.CompilerParams(
            dimension_semantics=("parallel",)),       # shards graphs on v7x's 2 TCs
    )(seed, x, a, w1c, b1, w2c, b2)


# --------------------------- graph-attention glue ------------------------------
def _attention_adjacency_stacked(rel_embs, a_rels, a_dists, edge_index,
                                 edge_type, edge_distance, num_nodes):
    """Dense (2, N, N) softmax-normalised attention adjacency, both layers at once.

    # TODO(synk): ARGCN_dep_distance_conv source is not in the reference; the
    # relation-embedding + distance attention form is an assumption. The
    # per-edge gather / segment-softmax / scatter-add (data-dependent indices)
    # has no clean Pallas equivalent and stays in JAX glue.
    """
    src = edge_index[0]
    dst = edge_index[1]
    rel = rel_embs[:, edge_type, :]                                   # (2, E, Fe)
    logits = (jnp.einsum('lef,lf->el', rel, a_rels)
              + a_dists[None, :] * edge_distance[:, None])            # (E, 2)
    logits = jax.nn.leaky_relu(logits, negative_slope=0.2)
    seg_max = jax.ops.segment_max(logits, dst, num_segments=num_nodes)
    seg_max = jnp.where(jnp.isfinite(seg_max), seg_max, 0.0)          # isolated nodes
    ex = jnp.exp(logits - seg_max[dst])
    den = jax.ops.segment_sum(ex, dst, num_segments=num_nodes)
    alpha = ex / jnp.maximum(den[dst], 1e-9)                          # (E, 2)
    adj = jnp.zeros((num_nodes, num_nodes, 2), jnp.float32).at[dst, src].add(alpha)
    return jnp.transpose(adj, (2, 0, 1))                              # (2, N, N)


@functools.partial(jax.jit, static_argnames=('training',))
def argcn_net_forward(params, x, edge_index, edge_type, edge_distance, seed,
                      training=False):
    n = x.shape[0]
    att = params['att']
    adj = _attention_adjacency_stacked(att['rel_embs'], att['a_rels'],
                                       att['a_dists'], edge_index, edge_type,
                                       edge_distance, n)
    a = adj.astype(jnp.bfloat16)[None]                 # (1, 2, N, N)
    xb = x.astype(jnp.bfloat16)[None]                  # (1, N, F)
    out_padded = argcn_fused(xb, a, params['w1c'], params['b1'],
                             params['w2c'], params['b2'], seed,
                             training=training)        # (1, N, CLASS_PAD)
    return out_padded[0, :, :NUM_CLASSES]


# ------------------------------ parameter init ---------------------------------
def init_params(key):
    ks = iter(jax.random.split(key, 12))

    def nrm(shape, scale=0.05):
        return scale * jax.random.normal(next(ks), shape, dtype=jnp.float32)

    # conv1 weights: (H, F) -> transposed & concatenated to (F, 2H) bf16
    w1 = nrm((HIDDEN_DIM, NUM_FEATURES))
    wr1 = nrm((HIDDEN_DIM, NUM_FEATURES))
    b1 = jnp.zeros((1, HIDDEN_DIM), jnp.float32)

    # conv2 weights: (9, H), zero-padded to (CLASS_PAD, H), then (H, 2*CLASS_PAD)
    w2 = nrm((NUM_CLASSES, HIDDEN_DIM))
    wr2 = nrm((NUM_CLASSES, HIDDEN_DIM))
    w2p = jnp.zeros((CLASS_PAD, HIDDEN_DIM), jnp.float32).at[:NUM_CLASSES].set(w2)
    wr2p = jnp.zeros((CLASS_PAD, HIDDEN_DIM), jnp.float32).at[:NUM_CLASSES].set(wr2)
    b2 = jnp.zeros((1, CLASS_PAD), jnp.float32)

    att = {
        'rel_embs': nrm((2, NUM_EDGE_TYPES, EDGE_FEATURE_DIM), 0.5),
        'a_rels': nrm((2, EDGE_FEATURE_DIM), 0.5),
        'a_dists': nrm((2,), 0.5),
    }
    return {
        'w1c': jnp.concatenate([w1.T, wr1.T], axis=1).astype(jnp.bfloat16),
        'b1': b1,
        'w2c': jnp.concatenate([w2p.T, wr2p.T], axis=1).astype(jnp.bfloat16),
        'b2': b2,
        'att': att,
    }


# ----------------------------------- main ---------------------------------------
if __name__ == "__main__":
    key = jax.random.PRNGKey(0)
    pkey, k1, k2, k3, k4, k5 = jax.random.split(key, 6)
    params = init_params(pkey)

    x = jax.random.normal(k1, (NUM_NODES, NUM_FEATURES), dtype=jnp.float32)
    src = jax.random.randint(k2, (NUM_EDGES,), 0, NUM_NODES)
    dst = jax.random.randint(k3, (NUM_EDGES,), 0, NUM_NODES)
    edge_index = jnp.stack([src, dst]).astype(jnp.int32)            # (2, E)
    edge_type = jax.random.randint(k4, (NUM_EDGES,), 0, NUM_EDGE_TYPES)
    edge_distance = jax.random.randint(k5, (NUM_EDGES,), 1, 12).astype(jnp.float32)
    seed = jnp.array([0], dtype=jnp.int32)

    # deterministic inference pass (set training=True to exercise the in-kernel
    # PRNG dropout matching F.dropout's training=True default)
    out = argcn_net_forward(params, x, edge_index, edge_type, edge_distance,
                            seed, training=False)
    out = jax.block_until_ready(out)

    assert out.shape == (NUM_NODES, NUM_CLASSES), out.shape
    assert bool(jnp.all(jnp.isfinite(out)))
    assert bool(jnp.all(out >= 0.0))        # final F.relu
    print("KERNEL_OK")
</pallas_src>

<mosaic_0001>
module attributes {stable_mosaic.version = 11 : i64} {
  func.func @_argcn_fused_kernel(%arg0: i32, %arg1: memref<1xi32, #tpu.memory_space<smem>>, %arg2: memref<1x64x768xbf16, #tpu.memory_space<vmem>>, %arg3: memref<1x2x64x64xbf16, #tpu.memory_space<vmem>>, %arg4: memref<768x512xbf16, #tpu.memory_space<vmem>>, %arg5: memref<1x256xf32, #tpu.memory_space<vmem>>, %arg6: memref<256x256xbf16, #tpu.memory_space<vmem>>, %arg7: memref<1x128xf32, #tpu.memory_space<vmem>>, %arg8: memref<1x64x128xf32, #tpu.memory_space<vmem>>) attributes {dimension_semantics = [#tpu.dimension_semantics<parallel>], iteration_bounds = array<i64: 1>, scalar_prefetch = 0 : i64, scratch_operands = 0 : i64, tpu.core_type = #tpu.core_type<tc>, window_params = [{transform_indices = @transform_0, window_bounds = array<i64: 1>}, {transform_indices = @transform_1, window_bounds = array<i64: 1, 64, 768>}, {transform_indices = @transform_2, window_bounds = array<i64: 1, 2, 64, 64>}, {pipeline_mode = #tpu.pipeline_mode<synchronous>, transform_indices = @transform_3, window_bounds = array<i64: 768, 512>}, {pipeline_mode = #tpu.pipeline_mode<synchronous>, transform_indices = @transform_4, window_bounds = array<i64: 1, 256>}, {pipeline_mode = #tpu.pipeline_mode<synchronous>, transform_indices = @transform_5, window_bounds = array<i64: 256, 256>}, {pipeline_mode = #tpu.pipeline_mode<synchronous>, transform_indices = @transform_6, window_bounds = array<i64: 1, 128>}, {transform_indices = @transform_7, window_bounds = array<i64: 1, 64, 128>}]} {
    %c0 = arith.constant 0 : index
    %c0_0 = arith.constant 0 : index
    %c0_1 = arith.constant 0 : index
    %0 = vector.load %arg2[%c0, %c0_0, %c0_1] : memref<1x64x768xbf16, #tpu.memory_space<vmem>>, vector<1x64x768xbf16>
    %1 = vector.shape_cast %0 : vector<1x64x768xbf16> to vector<64x768xbf16>
    %c0_2 = arith.constant 0 : index
    %c0_3 = arith.constant 0 : index
    %c0_4 = arith.constant 0 : index
    %c0_5 = arith.constant 0 : index
    %2 = vector.load %arg3[%c0_2, %c0_3, %c0_4, %c0_5] : memref<1x2x64x64xbf16, #tpu.memory_space<vmem>>, vector<1x1x64x64xbf16>
    %3 = vector.shape_cast %2 : vector<1x1x64x64xbf16> to vector<64x64xbf16>
    %c0_6 = arith.constant 0 : index
    %c1 = arith.constant 1 : index
    %c0_7 = arith.constant 0 : index
    %c0_8 = arith.constant 0 : index
    %4 = vector.load %arg3[%c0_6, %c1, %c0_7, %c0_8] : memref<1x2x64x64xbf16, #tpu.memory_space<vmem>>, vector<1x1x64x64xbf16>
    %5 = vector.shape_cast %4 : vector<1x1x64x64xbf16> to vector<64x64xbf16>
    %c0_9 = arith.constant 0 : index
    %c0_10 = arith.constant 0 : index
    %6 = vector.load %arg4[%c0_9, %c0_10] : memref<768x512xbf16, #tpu.memory_space<vmem>>, vector<768x512xbf16>
    %cst = arith.constant dense<0.000000e+00> : vector<64x512xf32>
    %7 = tpu.matmul %1, %6, %cst {dimension_numbers = #tpu.dot_dimension_numbers<[1], [0], [0], [1], [0, 0, 1, 1], [], []>} : vector<64x768xbf16>, vector<768x512xbf16>, vector<64x512xf32> -> vector<64x512xf32>
    %8 = vector.extract_strided_slice %7 {offsets = [0, 0], sizes = [64, 256], strides = [1, 1]} : vector<64x512xf32> to vector<64x256xf32>
    %9 = arith.truncf %8 : vector<64x256xf32> to vector<64x256xbf16>
    %cst_11 = arith.constant dense<0.000000e+00> : vector<64x256xf32>
    %10 = tpu.matmul %3, %9, %cst_11 {dimension_numbers = #tpu.dot_dimension_numbers<[1], [0], [0], [1], [0, 0, 1, 1], [], []>} : vector<64x64xbf16>, vector<64x256xbf16>, vector<64x256xf32> -> vector<64x256xf32>
    %11 = vector.extract_strided_slice %7 {offsets = [0, 256], sizes = [64, 256], strides = [1, 1]} : vector<64x512xf32> to vector<64x256xf32>
    %12 = arith.addf %10, %11 : vector<64x256xf32>
    %c0_12 = arith.constant 0 : index
    %c0_13 = arith.constant 0 : index
    %13 = vector.load %arg5[%c0_12, %c0_13] : memref<1x256xf32, #tpu.memory_space<vmem>>, vector<1x256xf32>
    %14 = vector.broadcast %13 : vector<1x256xf32> to vector<64x256xf32>
    %15 = arith.addf %12, %14 : vector<64x256xf32>
    %cst_14 = arith.constant 0.000000e+00 : f32
    %16 = vector.broadcast %cst_14 : f32 to vector<64x256xf32>
    %17 = arith.maximumf %15, %16 : vector<64x256xf32>
    %18 = arith.truncf %17 : vector<64x256xf32> to vector<64x256xbf16>
    %c0_15 = arith.constant 0 : index
    %c0_16 = arith.constant 0 : index
    %19 = vector.load %arg6[%c0_15, %c0_16] : memref<256x256xbf16, #tpu.memory_space<vmem>>, vector<256x256xbf16>
    %cst_17 = arith.constant dense<0.000000e+00> : vector<64x256xf32>
    %20 = tpu.matmul %18, %19, %cst_17 {dimension_numbers = #tpu.dot_dimension_numbers<[1], [0], [0], [1], [0, 0, 1, 1], [], []>} : vector<64x256xbf16>, vector<256x256xbf16>, vector<64x256xf32> -> vector<64x256xf32>
    %21 = vector.extract_strided_slice %20 {offsets = [0, 0], sizes = [64, 128], strides = [1, 1]} : vector<64x256xf32> to vector<64x128xf32>
    %22 = arith.truncf %21 : vector<64x128xf32> to vector<64x128xbf16>
    %cst_18 = arith.constant dense<0.000000e+00> : vector<64x128xf32>
    %23 = tpu.matmul %5, %22, %cst_18 {dimension_numbers = #tpu.dot_dimension_numbers<[1], [0], [0], [1], [0, 0, 1, 1], [], []>} : vector<64x64xbf16>, vector<64x128xbf16>, vector<64x128xf32> -> vector<64x128xf32>
    %24 = vector.extract_strided_slice %20 {offsets = [0, 128], sizes = [64, 128], strides = [1, 1]} : vector<64x256xf32> to vector<64x128xf32>
    %25 = arith.addf %23, %24 : vector<64x128xf32>
    %c0_19 = arith.constant 0 : index
    %c0_20 = arith.constant 0 : index
    %26 = vector.load %arg7[%c0_19, %c0_20] : memref<1x128xf32, #tpu.memory_space<vmem>>, vector<1x128xf32>
    %27 = vector.broadcast %26 : vector<1x128xf32> to vector<64x128xf32>
    %28 = arith.addf %25, %27 : vector<64x128xf32>
    %cst_21 = arith.constant 0.000000e+00 : f32
    %29 = vector.broadcast %cst_21 : f32 to vector<64x128xf32>
    %30 = arith.maximumf %28, %29 : vector<64x128xf32>
    %c0_22 = arith.constant 0 : index
    %c0_23 = arith.constant 0 : index
    %c0_24 = arith.constant 0 : index
    %31 = vector.load %arg8[%c0_22, %c0_23, %c0_24] : memref<1x64x128xf32, #tpu.memory_space<vmem>>, vector<1x64x128xf32>
    %32 = vector.shape_cast %31 : vector<1x64x128xf32> to vector<64x128xf32>
    %33 = vector.shape_cast %30 : vector<64x128xf32> to vector<1x64x128xf32>
    tpu.vector_store %arg8[%c0_22, %c0_23, %c0_24], %33 {strides = array<i32>} : memref<1x64x128xf32, #tpu.memory_space<vmem>>, vector<1x64x128xf32>,
    return
  }
  func.func @transform_0(%arg0: i32) -> i32 {
    %c0_i32 = arith.constant 0 : i32
    %c0_i32_0 = arith.constant 0 : i32
    return %c0_i32 : i32
  }
  func.func @transform_1(%arg0: i32) -> (i32, i32, i32) {
    %c0_i32 = arith.constant 0 : i32
    %c0_i32_0 = arith.constant 0 : i32
    %c0_i32_1 = arith.constant 0 : i32
    return %arg0, %c0_i32, %c0_i32_0 : i32, i32, i32
  }
  func.func @transform_2(%arg0: i32) -> (i32, i32, i32, i32) {
    %c0_i32 = arith.constant 0 : i32
    %c0_i32_0 = arith.constant 0 : i32
    %c0_i32_1 = arith.constant 0 : i32
    %c0_i32_2 = arith.constant 0 : i32
    return %arg0, %c0_i32, %c0_i32_0, %c0_i32_1 : i32, i32, i32, i32
  }
  func.func @transform_3(%arg0: i32) -> (i32, i32) {
    %c0_i32 = arith.constant 0 : i32
    %c0_i32_0 = arith.constant 0 : i32
    %c0_i32_1 = arith.constant 0 : i32
    return %c0_i32, %c0_i32_0 : i32, i32
  }
  func.func @transform_4(%arg0: i32) -> (i32, i32) {
    %c0_i32 = arith.constant 0 : i32
    %c0_i32_0 = arith.constant 0 : i32
    %c0_i32_1 = arith.constant 0 : i32
    return %c0_i32, %c0_i32_0 : i32, i32
  }
  func.func @transform_5(%arg0: i32) -> (i32, i32) {
    %c0_i32 = arith.constant 0 : i32
    %c0_i32_0 = arith.constant 0 : i32
    %c0_i32_1 = arith.constant 0 : i32
    return %c0_i32, %c0_i32_0 : i32, i32
  }
  func.func @transform_6(%arg0: i32) -> (i32, i32) {
    %c0_i32 = arith.constant 0 : i32
    %c0_i32_0 = arith.constant 0 : i32
    %c0_i32_1 = arith.constant 0 : i32
    return %c0_i32, %c0_i32_0 : i32, i32
  }
  func.func @transform_7(%arg0: i32) -> (i32, i32, i32) {
    %c0_i32 = arith.constant 0 : i32
    %c0_i32_0 = arith.constant 0 : i32
    %c0_i32_1 = arith.constant 0 : i32
    return %arg0, %c0_i32, %c0_i32_0 : i32, i32, i32
  }
}

</mosaic_0001>

<bundles_post_ra>
// kernel: argcn_net_forward.1
= control target key start
LH: loop header
LB: loop body
LE: loop exit
PB: predicated region body
PF: predicated region fallthrough
CT: control target
= control target key end

     0   :  { %vm1807_vm0 = vcmask 523264   ;;  %s4047_s0 = inlined_call_operand.<no memory space> [shape: s32[1], index: 0, kind: input, shape index: {}]   ;;  %s4048_s3 = inlined_call_operand.vmem [shape: bf16[768,512], index: 3, kind: input, shape index: {}]   ;;  %s4049_s1 = inlined_call_operand.vmem [shape: bf16[1,64,768], index: 1, kind: input, shape index: {}]   ;;  %s4050_s2 = inlined_call_operand.vmem [shape: bf16[1,2,64,64], index: 2, kind: input, shape index: {}]   ;;  %s4051_s5 = inlined_call_operand.vmem [shape: bf16[256,256], index: 5, kind: input, shape index: {}]   ;;  %s4052_s4 = inlined_call_operand.vmem [shape: f32[1,256], index: 4, kind: input, shape index: {}]   ;;  %s4053_s6 = inlined_call_operand.vmem [shape: f32[1,128], index: 6, kind: input, shape index: {}]   ;;  %s4054_s7 = inlined_call_operand.vmem [shape: f32[1,64,128], index: 7, kind: output, shape index: {}]  }
   0x1   :  { %v2724_v0 = vld [vmem:[%s4048_s3 + $0x4] ss:$16 sps:$4 sm:$0xff]   ;;  %v2726_v1 = vld [vmem:[%s4048_s3] ss:$16 sps:$4 sm:$0xff]   ;;  %v2901_v51 = vld [vmem:[%s4048_s3 + $0xc] ss:$16 sps:$4 sm:$0xff]  }
   0x2   :  { %1341 = vmatprep.subr.bf16.mxu0 %v2724_v0  ;;  %v2727_v2 = vld [vmem:[%s4048_s3 + $0x24] ss:$16 sps:$4 sm:$0xff]   ;;  %v2729_v3 = vld [vmem:[%s4048_s3 + $0x20] ss:$16 sps:$4 sm:$0xff]   ;;  %v2903_v52 = vld [vmem:[%s4048_s3 + $0x8] ss:$16 sps:$4 sm:$0xff]   ;;  %1560 = vmatprep.subr.bf16.mxu1 %v2901_v51 }
   0x3   :  { %1342 = vmatpush1.bf16.msra.mxu0 %v2726_v1  ;;  %v2730_v4 = vld [vmem:[%s4048_s3 + $0x44] ss:$16 sps:$4 sm:$0xff]   ;;  %v2732_v5 = vld [vmem:[%s4048_s3 + $0x40] ss:$16 sps:$4 sm:$0xff]   ;;  %1561 = vmatpush1.bf16.msra.mxu1 %v2903_v52  ;;  %v2907_v58 = vld [vmem:[%s4048_s3 + $0x2c] ss:$16 sps:$4 sm:$0xff]  }
   0x4   :  { %1343 = vmatprep.subr.bf16.mxu0 %v2727_v2  ;;  %v2733_v6 = vld [vmem:[%s4048_s3 + $0x64] ss:$16 sps:$4 sm:$0xff]   ;;  %v2735_v7 = vld [vmem:[%s4048_s3 + $0x60] ss:$16 sps:$4 sm:$0xff]   ;;  %v2909_v59 = vld [vmem:[%s4048_s3 + $0x28] ss:$16 sps:$4 sm:$0xff]   ;;  %1562 = vmatprep.subr.bf16.mxu1 %v2907_v58 }
   0x5   :  { %v2736_v8 = vld [vmem:[%s4048_s3 + $0x84] ss:$16 sps:$4 sm:$0xff]   ;;  %v2738_v9 = vld [vmem:[%s4048_s3 + $0x80] ss:$16 sps:$4 sm:$0xff]   ;;  %v2910_v60 = vld [vmem:[%s4048_s3 + $0x4c] ss:$16 sps:$4 sm:$0xff]  }
   0x6   :  { %v2739_v10 = vld [vmem:[%s4048_s3 + $0xa4] ss:$16 sps:$4 sm:$0xff]   ;;  %v2741_v11 = vld [vmem:[%s4048_s3 + $0xa0] ss:$16 sps:$4 sm:$0xff]   ;;  %v2912_v63 = vld [vmem:[%s4048_s3 + $0x48] ss:$16 sps:$4 sm:$0xff]  }
   0x7   :  { %1344 = vmatpush1.bf16.msra.mxu0 %v2729_v3  ;;  %v2742_v12 = vld [vmem:[%s4048_s3 + $0xc4] ss:$16 sps:$4 sm:$0xff]   ;;  %v2744_v14 = vld [vmem:[%s4048_s3 + $0xc0] ss:$16 sps:$4 sm:$0xff]   ;;  %1563 = vmatpush1.bf16.msra.mxu1 %v2909_v59  ;;  %v2913_v0 = vld [vmem:[%s4048_s3 + $0x6c] ss:$16 sps:$4 sm:$0xff]  }
   0x8   :  { %1345 = vmatprep.subr.bf16.mxu0 %v2730_v4  ;;  %v2774_v13 = vld [vmem:[%s4049_s1 + $0x4] ss:$24 sps:$4 sm:$0xff]   ;;  %v2747_v16 = vld [vmem:[%s4048_s3 + $0xe0] ss:$16 sps:$4 sm:$0xff]   ;;  %v3258_v36 = vld [vmem:[%s4049_s1 + $0x34] ss:$24 sps:$4 sm:$0xff]   ;;  %1564 = vmatprep.subr.bf16.mxu1 %v2910_v60 }
   0x9   :  { %v2745_v15 = vld [vmem:[%s4048_s3 + $0xe4] ss:$16 sps:$4 sm:$0xff]   ;;  %1373 = vmatprep.mubr.bf16.mxu0 %v2774_v13  ;;  %1592 = vmatprep.mubr.bf16.mxu1 %v2774_v13  ;;  %v2750_v18 = vld [vmem:[%s4048_s3 + $0x100] ss:$16 sps:$4 sm:$0xff]   ;;  %v2915_v3 = vld [vmem:[%s4048_s3 + $0x68] ss:$16 sps:$4 sm:$0xff]  }
   0xa   :  { %v2748_v17 = vld [vmem:[%s4048_s3 + $0x104] ss:$16 sps:$4 sm:$0xff]   ;;  %v2753_v20 = vld [vmem:[%s4048_s3 + $0x120] ss:$16 sps:$4 sm:$0xff]   ;;  %v2916_v4 = vld [vmem:[%s4048_s3 + $0x8c] ss:$16 sps:$4 sm:$0xff]  }
   0xb   :  { %1346 = vmatpush1.bf16.msra.mxu0 %v2732_v5  ;;  %v2751_v19 = vld [vmem:[%s4048_s3 + $0x124] ss:$16 sps:$4 sm:$0xff]   ;;  %v2756_v22 = vld [vmem:[%s4048_s3 + $0x140] ss:$16 sps:$4 sm:$0xff]   ;;  %1565 = vmatpush1.bf16.msra.mxu1 %v2912_v63  ;;  %v2948_v59 = vld [vmem:[%s4048_s3 + $0x1c8] ss:$16 sps:$4 sm:$0xff]  }
   0xc   :  { %1347 = vmatprep.subr.bf16.mxu0 %v2733_v6  ;;  %v2754_v21 = vld [vmem:[%s4048_s3 + $0x144] ss:$16 sps:$4 sm:$0xff]   ;;  %v2759_v24 = vld [vmem:[%s4048_s3 + $0x160] ss:$16 sps:$4 sm:$0xff]   ;;  %1566 = vmatprep.subr.bf16.mxu1 %v2913_v0 }
   0xd   :  { %v2757_v23 = vld [vmem:[%s4048_s3 + $0x164] ss:$16 sps:$4 sm:$0xff]   ;;  %v2762_v26 = vld [vmem:[%s4048_s3 + $0x180] ss:$16 sps:$4 sm:$0xff]  }
   0xe   :  { %v2760_v25 = vld [vmem:[%s4048_s3 + $0x184] ss:$16 sps:$4 sm:$0xff]   ;;  %v2765_v28 = vld [vmem:[%s4048_s3 + $0x1a0] ss:$16 sps:$4 sm:$0xff]  }
   0xf   :  { %1348 = vmatpush1.bf16.msra.mxu0 %v2735_v7  ;;  %v2763_v27 = vld [vmem:[%s4048_s3 + $0x1a4] ss:$16 sps:$4 sm:$0xff]   ;;  %v2768_v30 = vld [vmem:[%s4048_s3 + $0x1c0] ss:$16 sps:$4 sm:$0xff]   ;;  %1567 = vmatpush1.bf16.msra.mxu1 %v2915_v3  ;;  %v2918_v7 = vld [vmem:[%s4048_s3 + $0x88] ss:$16 sps:$4 sm:$0xff]  }
  0x10   :  { %1349 = vmatprep.subr.bf16.mxu0 %v2736_v8  ;;  %v2766_v29 = vld [vmem:[%s4048_s3 + $0x1c4] ss:$16 sps:$4 sm:$0xff]   ;;  %v2771_v32 = vld [vmem:[%s4048_s3 + $0x1e0] ss:$16 sps:$4 sm:$0xff]   ;;  %1568 = vmatprep.subr.bf16.mxu1 %v2916_v4  ;;  %v2919_v8 = vld [vmem:[%s4048_s3 + $0xac] ss:$16 sps:$4 sm:$0xff]  }
  0x11   :  { %v2769_v31 = vld [vmem:[%s4048_s3 + $0x1e4] ss:$16 sps:$4 sm:$0xff]   ;;  %v3250_v34 = vld [vmem:[%s4049_s1] ss:$24 sps:$4 sm:$0xff]   ;;  %v3274_v40 = vld [vmem:[%s4049_s1 + $0x30] ss:$24 sps:$4 sm:$0xff]  }
  0x12   :  { %v2777_v33 = vld [vmem:[%s4048_s3 + $0x204] ss:$16 sps:$4 sm:$0xff]   ;;  %v2775_v35 = vld [vmem:[%s4048_s3 + $0x200] ss:$16 sps:$4 sm:$0xff]  }
  0x13   :  { %1350 = vmatpush1.bf16.msra.mxu0 %v2738_v9  ;;  %v2780_v37 = vld [vmem:[%s4048_s3 + $0x224] ss:$16 sps:$4 sm:$0xff]   ;;  %v2778_v38 = vld [vmem:[%s4048_s3 + $0x220] ss:$16 sps:$4 sm:$0xff]   ;;  %1569 = vmatpush1.bf16.msra.mxu1 %v2918_v7  ;;  %v2957_v7 = vld [vmem:[%s4048_s3 + $0x22c] ss:$16 sps:$4 sm:$0xff]  }
  0x14   :  { %1351 = vmatprep.subr.bf16.mxu0 %v2739_v10  ;;  %v2783_v39 = vld [vmem:[%s4048_s3 + $0x244] ss:$16 sps:$4 sm:$0xff]   ;;  %v2781_v41 = vld [vmem:[%s4048_s3 + $0x240] ss:$16 sps:$4 sm:$0xff]   ;;  %1570 = vmatprep.subr.bf16.mxu1 %v2919_v8 }
  0x15   :  { %v3282_v42 = vld [vmem:[%s4049_s1 + $0x64] ss:$24 sps:$4 sm:$0xff]   ;;  %v2784_v44 = vld [vmem:[%s4048_s3 + $0x260] ss:$16 sps:$4 sm:$0xff]   ;;  %v3309_v49 = vld [vmem:[%s4049_s1 + $0x94] ss:$24 sps:$4 sm:$0xff]  }
  0x16   :  { %v2786_v43 = vld [vmem:[%s4048_s3 + $0x264] ss:$16 sps:$4 sm:$0xff]   ;;  %v2787_v46 = vld [vmem:[%s4048_s3 + $0x280] ss:$16 sps:$4 sm:$0xff]  }
  0x17   :  { %1352 = vmatpush1.bf16.msra.mxu0 %v2741_v11  ;;  %v2789_v45 = vld [vmem:[%s4048_s3 + $0x284] ss:$16 sps:$4 sm:$0xff]   ;;  %v3304_v48 = vld [vmem:[%s4049_s1 + $0x60] ss:$24 sps:$4 sm:$0xff]   ;;  %v3328_v54 = vld [vmem:[%s4049_s1 + $0x90] ss:$24 sps:$4 sm:$0xff]  }
  0x18   :  { %1353 = vmatprep.subr.bf16.mxu0 %v2742_v12  ;;  %v2792_v47 = vld [vmem:[%s4048_s3 + $0x2a4] ss:$16 sps:$4 sm:$0xff]   ;;  %v2790_v50 = vld [vmem:[%s4048_s3 + $0x2a0] ss:$16 sps:$4 sm:$0xff]   ;;  %v2921_v11 = vld [vmem:[%s4048_s3 + $0xa8] ss:$16 sps:$4 sm:$0xff]  }
  0x19   :  { %v2795_v53 = vld [vmem:[%s4048_s3 + $0x2c4] ss:$16 sps:$4 sm:$0xff]   ;;  %v2793_v55 = vld [vmem:[%s4048_s3 + $0x2c0] ss:$16 sps:$4 sm:$0xff]   ;;  %v2922_v12 = vld [vmem:[%s4048_s3 + $0xcc] ss:$16 sps:$4 sm:$0xff]   ;;  %1571 = vmatpush1.bf16.msra.mxu1 %v2921_v11 }
  0x1a   :  { %v3336_v56 = vld [vmem:[%s4049_s1 + $0xc] ss:$24 sps:$4 sm:$0xff]   ;;  %v2796_v61 = vld [vmem:[%s4048_s3 + $0x2e0] ss:$16 sps:$4 sm:$0xff]   ;;  %1572 = vmatprep.subr.bf16.mxu1 %v2922_v12  ;;  %v3543_v63 = vld [vmem:[%s4049_s1 + $0x9c] ss:$24 sps:$4 sm:$0xff]  }
  0x1b   :  { %1354 = vmatpush1.bf16.msra.mxu0 %v2744_v14  ;;  %v2798_v57 = vld [vmem:[%s4048_s3 + $0x2e4] ss:$16 sps:$4 sm:$0xff]   ;;  %v2799_v1 = vld [vmem:[%s4048_s3 + $0x300] ss:$16 sps:$4 sm:$0xff]   ;;  %v2955_v11 = vld [vmem:[%s4048_s3 + $0x228] ss:$16 sps:$4 sm:$0xff]  }
  0x1c   :  { %1355 = vmatprep.subr.bf16.mxu0 %v2745_v15  ;;  %v2801_v62 = vld [vmem:[%s4048_s3 + $0x304] ss:$16 sps:$4 sm:$0xff]   ;;  %v2802_v5 = vld [vmem:[%s4048_s3 + $0x320] ss:$16 sps:$4 sm:$0xff]   ;;  %v2924_v15 = vld [vmem:[%s4048_s3 + $0xc8] ss:$16 sps:$4 sm:$0xff]  }
  0x1d   :  { %v2804_v2 = vld [vmem:[%s4048_s3 + $0x324] ss:$16 sps:$4 sm:$0xff]   ;;  %v2807_v9 = vld [vmem:[%s4048_s3 + $0x340] ss:$16 sps:$4 sm:$0xff]   ;;  %1573 = vmatpush1.bf16.msra.mxu1 %v2924_v15  ;;  %v2960_v12 = vld [vmem:[%s4048_s3 + $0x24c] ss:$16 sps:$4 sm:$0xff]  }
  0x1e   :  { %v2809_v6 = vld [vmem:[%s4048_s3 + $0x344] ss:$16 sps:$4 sm:$0xff]   ;;  %v2811_v13 = vld [vmem:[%s4048_s3 + $0x360] ss:$16 sps:$4 sm:$0xff]  }
  0x1f   :  { %1356 = vmatpush1.bf16.msra.mxu0 %v2747_v16  ;;  %v2813_v10 = vld [vmem:[%s4048_s3 + $0x364] ss:$16 sps:$4 sm:$0xff]   ;;  %v2925_v16 = vld [vmem:[%s4048_s3 + $0xec] ss:$16 sps:$4 sm:$0xff]   ;;  %v3532_v60 = vld [vmem:[%s4049_s1 + $0x68] ss:$24 sps:$4 sm:$0xff]  }
  0x20   :  { %1357 = vmatprep.subr.bf16.mxu0 %v2748_v17  ;;  %v2818_v14 = vld [vmem:[%s4048_s3 + $0x384] ss:$16 sps:$4 sm:$0xff]   ;;  %v2816_v17 = vld [vmem:[%s4048_s3 + $0x380] ss:$16 sps:$4 sm:$0xff]   ;;  %1574 = vmatprep.subr.bf16.mxu1 %v2925_v16 }
  0x21   :  { %v3507_v51 = vld [vmem:[%s4049_s1 + $0x6c] ss:$24 sps:$4 sm:$0xff]   ;;  %v2850_v3 = vld [vmem:[%s4048_s3 + $0x4a0] ss:$16 sps:$4 sm:$0xff]  }
  0x22   :  { %v2846_v52 = vld [vmem:[%s4048_s3 + $0x464] ss:$16 sps:$4 sm:$0xff]   ;;  %v2853_v8 = vld [vmem:[%s4048_s3 + $0x4c0] ss:$16 sps:$4 sm:$0xff]  }
  0x23   :  { %1358 = vmatpush1.bf16.msra.mxu0 %v2750_v18  ;;  %v2822_v18 = vld [vmem:[%s4048_s3 + $0x3a4] ss:$16 sps:$4 sm:$0xff]   ;;  %v2859_v15 = vld [vmem:[%s4048_s3 + $0x500] ss:$16 sps:$4 sm:$0xff]  }
  0x24   :  { %1359 = vmatprep.subr.bf16.mxu0 %v2751_v19  ;;  %v2927_v19 = vld [vmem:[%s4048_s3 + $0xe8] ss:$16 sps:$4 sm:$0xff]   ;;  %v2849_v58 = vld [vmem:[%s4048_s3 + $0x484] ss:$16 sps:$4 sm:$0xff]  }
  0x25   :  { %1575 = vmatpush1.bf16.msra.mxu1 %v2927_v19  ;;  %v2852_v0 = vld [vmem:[%s4048_s3 + $0x4a4] ss:$16 sps:$4 sm:$0xff]   ;;  %v2862_v19 = vld [vmem:[%s4048_s3 + $0x520] ss:$16 sps:$4 sm:$0xff]  }
  0x26   :  { %v2855_v4 = vld [vmem:[%s4048_s3 + $0x4c4] ss:$16 sps:$4 sm:$0xff]  }
  0x27   :  { %1360 = vmatpush1.bf16.msra.mxu0 %v2753_v20  ;;  %v2928_v20 = vld [vmem:[%s4048_s3 + $0x10c] ss:$16 sps:$4 sm:$0xff]   ;;  %v2864_v16 = vld [vmem:[%s4048_s3 + $0x524] ss:$16 sps:$4 sm:$0xff]  }
  0x28   :  { %1361 = vmatprep.subr.bf16.mxu0 %v2754_v21  ;;  %v2820_v21 = vld [vmem:[%s4048_s3 + $0x3a0] ss:$16 sps:$4 sm:$0xff]   ;;  %1576 = vmatprep.subr.bf16.mxu1 %v2928_v20  ;;  %v2969_v20 = vld [vmem:[%s4048_s3 + $0x2ac] ss:$16 sps:$4 sm:$0xff]  }
  0x2b   :  { %1362 = vmatpush1.bf16.msra.mxu0 %v2756_v22  ;;  %v2827_v22 = vld [vmem:[%s4048_s3 + $0x3c4] ss:$16 sps:$4 sm:$0xff]  }
  0x2c   :  { %1363 = vmatprep.subr.bf16.mxu0 %v2757_v23  ;;  %v2930_v23 = vld [vmem:[%s4048_s3 + $0x108] ss:$16 sps:$4 sm:$0xff]  }
  0x2d   :  { %1577 = vmatpush1.bf16.msra.mxu1 %v2930_v23  ;;  %v2967_v23 = vld [vmem:[%s4048_s3 + $0x2a8] ss:$16 sps:$4 sm:$0xff]  }
  0x2f   :  { %1364 = vmatpush1.bf16.msra.mxu0 %v2759_v24  ;;  %v2931_v24 = vld [vmem:[%s4048_s3 + $0x12c] ss:$16 sps:$4 sm:$0xff]  }
  0x30   :  { %1365 = vmatprep.subr.bf16.mxu0 %v2760_v25  ;;  %v2825_v25 = vld [vmem:[%s4048_s3 + $0x3c0] ss:$16 sps:$4 sm:$0xff]   ;;  %1578 = vmatprep.subr.bf16.mxu1 %v2931_v24  ;;  %v2972_v24 = vld [vmem:[%s4048_s3 + $0x2cc] ss:$16 sps:$4 sm:$0xff]  }
  0x33   :  { %1366 = vmatpush1.bf16.msra.mxu0 %v2762_v26  ;;  %v2831_v26 = vld [vmem:[%s4048_s3 + $0x3e4] ss:$16 sps:$4 sm:$0xff]  }
  0x34   :  { %1367 = vmatprep.subr.bf16.mxu0 %v2763_v27  ;;  %v2933_v27 = vld [vmem:[%s4048_s3 + $0x128] ss:$16 sps:$4 sm:$0xff]  }
  0x35   :  { %1579 = vmatpush1.bf16.msra.mxu1 %v2933_v27  ;;  %v2877_v27 = vld [vmem:[%s4048_s3 + $0x580] ss:$16 sps:$4 sm:$0xff]  }
  0x37   :  { %1368 = vmatpush1.bf16.msra.mxu0 %v2765_v28  ;;  %v2934_v28 = vld [vmem:[%s4048_s3 + $0x14c] ss:$16 sps:$4 sm:$0xff]  }
  0x38   :  { %1369 = vmatprep.subr.bf16.mxu0 %v2766_v29  ;;  %v2829_v29 = vld [vmem:[%s4048_s3 + $0x3e0] ss:$16 sps:$4 sm:$0xff]   ;;  %1580 = vmatprep.subr.bf16.mxu1 %v2934_v28  ;;  %v2882_v28 = vld [vmem:[%s4048_s3 + $0x5a4] ss:$16 sps:$4 sm:$0xff]  }
  0x3b   :  { %1370 = vmatpush1.bf16.msra.mxu0 %v2768_v30  ;;  %v2837_v30 = vld [vmem:[%s4048_s3 + $0x404] ss:$16 sps:$4 sm:$0xff]  }
  0x3c   :  { %1371 = vmatprep.subr.bf16.mxu0 %v2769_v31  ;;  %v2936_v31 = vld [vmem:[%s4048_s3 + $0x148] ss:$16 sps:$4 sm:$0xff]  }
  0x3d   :  { %1581 = vmatpush1.bf16.msra.mxu1 %v2936_v31  ;;  %v2880_v31 = vld [vmem:[%s4048_s3 + $0x5a0] ss:$16 sps:$4 sm:$0xff]  }
  0x3f   :  { %1372 = vmatpush1.bf16.msra.mxu0 %v2771_v32  ;;  %v3460_v32 = vld [vmem:[%s4049_s1 + $0x8] ss:$24 sps:$4 sm:$0xff]  }
  0x40   :  { %1414 = vmatprep.subr.bf16.mxu0 %v2777_v33  ;;  %v2937_v33 = vld [vmem:[%s4048_s3 + $0x16c] ss:$16 sps:$4 sm:$0xff]  }
  0x41   :  { %1582 = vmatprep.subr.bf16.mxu1 %v2937_v33  ;;  %v2981_v33 = vld [vmem:[%s4048_s3 + $0x32c] ss:$16 sps:$4 sm:$0xff]  }
  0x42   :  { %1374 = vmatmul.mubr.bf16.vlgmr.msra.gmra.mrb[0].mxu0 %v3250_v34 }
  0x43   :  { %1415 = vmatpush1.bf16.msra.mxu0 %v2775_v35  ;;  %1383 = vmatprep.mubr.bf16.mxu0 %v3258_v36  ;;  %v2835_v35 = vld [vmem:[%s4048_s3 + $0x400] ss:$16 sps:$4 sm:$0xff]  }
  0x44   :  { %1416 = vmatprep.subr.bf16.mxu0 %v2780_v37  ;;  %v3471_v37 = vld [vmem:[%s4049_s1 + $0x3c] ss:$24 sps:$4 sm:$0xff]  }
  0x47   :  { %1417 = vmatpush1.bf16.msra.mxu0 %v2778_v38  ;;  %v2840_v38 = vld [vmem:[%s4048_s3 + $0x424] ss:$16 sps:$4 sm:$0xff]  }
  0x48   :  { %1418 = vmatprep.subr.bf16.mxu0 %v2783_v39  ;;  %v2939_v39 = vld [vmem:[%s4048_s3 + $0x168] ss:$16 sps:$4 sm:$0xff]  }
  0x49   :  { %1583 = vmatpush1.bf16.msra.mxu1 %v2939_v39  ;;  %v2979_v39 = vld [vmem:[%s4048_s3 + $0x328] ss:$16 sps:$4 sm:$0xff]  }
  0x4a   :  { %1384 = vmatmul.mubr.bf16.gmra.mrb[4].mxu0 %v3274_v40 }
  0x4b   :  { %1419 = vmatpush1.bf16.msra.mxu0 %v2781_v41  ;;  %1393 = vmatprep.mubr.bf16.mxu0 %v3282_v42  ;;  %v2940_v41 = vld [vmem:[%s4048_s3 + $0x18c] ss:$16 sps:$4 sm:$0xff]  }
  0x4c   :  { %1420 = vmatprep.subr.bf16.mxu0 %v2786_v43  ;;  %v2838_v43 = vld [vmem:[%s4048_s3 + $0x420] ss:$16 sps:$4 sm:$0xff]   ;;  %1584 = vmatprep.subr.bf16.mxu1 %v2940_v41  ;;  %v2984_v41 = vld [vmem:[%s4048_s3 + $0x34c] ss:$16 sps:$4 sm:$0xff]  }
  0x4f   :  { %1421 = vmatpush1.bf16.msra.mxu0 %v2784_v44  ;;  %v2843_v44 = vld [vmem:[%s4048_s3 + $0x444] ss:$16 sps:$4 sm:$0xff]  }
  0x50   :  { %1422 = vmatprep.subr.bf16.mxu0 %v2789_v45  ;;  %v2942_v45 = vld [vmem:[%s4048_s3 + $0x188] ss:$16 sps:$4 sm:$0xff]  }
  0x51   :  { %1585 = vmatpush1.bf16.msra.mxu1 %v2942_v45  ;;  %v3705_v45 = vld [vmem:[%s4049_s1 + $0x10] ss:$24 sps:$4 sm:$0xff]  }
  0x52   :  { %1394 = vmatmul.mubr.bf16.gmra.mrb[8].mxu0 %v3304_v48 }
  0x53   :  { %1423 = vmatpush1.bf16.msra.mxu0 %v2787_v46  ;;  %1403 = vmatprep.mubr.bf16.mxu0 %v3309_v49  ;;  %v3496_v46 = vld [vmem:[%s4049_s1 + $0x38] ss:$24 sps:$4 sm:$0xff]  }
  0x54   :  { %1424 = vmatprep.subr.bf16.mxu0 %v2792_v47  ;;  %v2943_v47 = vld [vmem:[%s4048_s3 + $0x1ac] ss:$16 sps:$4 sm:$0xff]  }
  0x55   :  { %1586 = vmatprep.subr.bf16.mxu1 %v2943_v47  ;;  %v2987_v47 = vld [vmem:[%s4048_s3 + $0x36c] ss:$16 sps:$4 sm:$0xff]  }
  0x57   :  { %1425 = vmatpush1.bf16.msra.mxu0 %v2790_v50  ;;  %v2841_v50 = vld [vmem:[%s4048_s3 + $0x440] ss:$16 sps:$4 sm:$0xff]  }
  0x58   :  { %1426 = vmatprep.subr.bf16.mxu0 %v2795_v53  ;;  %v2945_v53 = vld [vmem:[%s4048_s3 + $0x1a8] ss:$16 sps:$4 sm:$0xff]  }
  0x59   :  { %1587 = vmatpush1.bf16.msra.mxu1 %v2945_v53  ;;  %v2990_v53 = vld [vmem:[%s4048_s3 + $0x38c] ss:$16 sps:$4 sm:$0xff]  }
  0x5a   :  { %1404 = vmatmul.mubr.bf16.gmra.mrb[12].mxu0 %v3328_v54 }
  0x5b   :  { %1427 = vmatpush1.bf16.msra.mxu0 %v2793_v55  ;;  %1446 = vmatprep.mubr.bf16.mxu0 %v3336_v56  ;;  %v2946_v55 = vld [vmem:[%s4048_s3 + $0x1cc] ss:$16 sps:$4 sm:$0xff]  }
  0x5c   :  { %1428 = vmatprep.subr.bf16.mxu0 %v2798_v57  ;;  %v2844_v57 = vld [vmem:[%s4048_s3 + $0x460] ss:$16 sps:$4 sm:$0xff]   ;;  %1588 = vmatprep.subr.bf16.mxu1 %v2946_v55  ;;  %v2988_v55 = vld [vmem:[%s4048_s3 + $0x388] ss:$16 sps:$4 sm:$0xff]  }
  0x5d   :  { %1589 = vmatpush1.bf16.msra.mxu1 %v2948_v59  ;;  %v3737_v59 = vld [vmem:[%s4049_s1 + $0x74] ss:$24 sps:$4 sm:$0xff]  }
  0x5f   :  { %1429 = vmatpush1.bf16.msra.mxu0 %v2796_v61  ;;  %v2949_v61 = vld [vmem:[%s4048_s3 + $0x1ec] ss:$16 sps:$4 sm:$0xff]  }
  0x60   :  { %1430 = vmatprep.subr.bf16.mxu0 %v2801_v62  ;;  %v2847_v62 = vld [vmem:[%s4048_s3 + $0x480] ss:$16 sps:$4 sm:$0xff]   ;;  %1590 = vmatprep.subr.bf16.mxu1 %v2949_v61  ;;  %v2991_v61 = vld [vmem:[%s4048_s3 + $0x3a8] ss:$16 sps:$4 sm:$0xff]  }
  0x63   :  { %1431 = vmatpush1.bf16.msra.mxu0 %v2799_v1  ;;  %v2951_v1 = vld [vmem:[%s4048_s3 + $0x1e8] ss:$16 sps:$4 sm:$0xff]  }
  0x64   :  { %1432 = vmatprep.subr.bf16.mxu0 %v2804_v2  ;;  %v2954_v2 = vld [vmem:[%s4048_s3 + $0x20c] ss:$16 sps:$4 sm:$0xff]   ;;  %1591 = vmatpush1.bf16.msra.mxu1 %v2951_v1  ;;  %v3753_v1 = vld [vmem:[%s4049_s1 + $0x70] ss:$24 sps:$4 sm:$0xff]  }
  0x65   :  { %1633 = vmatprep.subr.bf16.mxu1 %v2954_v2  ;;  %v2999_v2 = vld [vmem:[%s4048_s3 + $0x3ec] ss:$16 sps:$4 sm:$0xff]  }
  0x67   :  { %1433 = vmatpush1.bf16.msra.mxu0 %v2802_v5  ;;  %v2952_v5 = vld [vmem:[%s4048_s3 + $0x208] ss:$16 sps:$4 sm:$0xff]   ;;  %1593 = vmatmul.mubr.bf16.vlgmr.msra.gmra.mrb[0].mxu1 %v3250_v34  ;;  %v2861_v34 = vld [vmem:[%s4048_s3 + $0x504] ss:$16 sps:$4 sm:$0xff]  }
  0x68   :  { %1434 = vmatprep.subr.bf16.mxu0 %v2809_v6  ;;  %v3568_v6 = vld [vmem:[%s4049_s1 + $0x98] ss:$24 sps:$4 sm:$0xff]   ;;  %1634 = vmatpush1.bf16.msra.mxu1 %v2952_v5  ;;  %v3002_v5 = vld [vmem:[%s4048_s3 + $0x40c] ss:$16 sps:$4 sm:$0xff]  }
  0x69   :  { %1602 = vmatprep.mubr.bf16.mxu1 %v3258_v36  ;;  %1635 = vmatprep.subr.bf16.mxu1 %v2957_v7  ;;  %v2958_v36 = vld [vmem:[%s4048_s3 + $0x248] ss:$16 sps:$4 sm:$0xff]  }
  0x6a   :  { %v3000_v7 = vld [vmem:[%s4048_s3 + $0x408] ss:$16 sps:$4 sm:$0xff]  }
  0x6b   :  { %1435 = vmatpush1.bf16.msra.mxu0 %v2807_v9  ;;  %v3579_v9 = vld [vmem:[%s4049_s1 + $0x14] ss:$24 sps:$4 sm:$0xff]  }
  0x6c   :  { %1436 = vmatprep.subr.bf16.mxu0 %v2813_v10  ;;  %v2858_v10 = vld [vmem:[%s4048_s3 + $0x4e4] ss:$16 sps:$4 sm:$0xff]   ;;  %1636 = vmatpush1.bf16.msra.mxu1 %v2955_v11  ;;  %v3003_v11 = vld [vmem:[%s4048_s3 + $0x428] ss:$16 sps:$4 sm:$0xff]  }
  0x6d   :  { %1637 = vmatprep.subr.bf16.mxu1 %v2960_v12  ;;  %v3008_v12 = vld [vmem:[%s4048_s3 + $0x44c] ss:$16 sps:$4 sm:$0xff]  }
  0x6f   :  { %1437 = vmatpush1.bf16.msra.mxu0 %v2811_v13  ;;  %v2856_v13 = vld [vmem:[%s4048_s3 + $0x4e0] ss:$16 sps:$4 sm:$0xff]   ;;  %1603 = vmatmul.mubr.bf16.gmra.mrb[4].mxu1 %v3274_v40  ;;  %v2870_v40 = vld [vmem:[%s4048_s3 + $0x544] ss:$16 sps:$4 sm:$0xff]  }
  0x70   :  { %1438 = vmatprep.subr.bf16.mxu0 %v2818_v14  ;;  %v2963_v14 = vld [vmem:[%s4048_s3 + $0x26c] ss:$16 sps:$4 sm:$0xff]   ;;  %1638 = vmatpush1.bf16.msra.mxu1 %v2958_v36  ;;  %v3012_v36 = vld [vmem:[%s4048_s3 + $0x488] ss:$16 sps:$4 sm:$0xff]  }
  0x71   :  { %1612 = vmatprep.mubr.bf16.mxu1 %v3282_v42  ;;  %1639 = vmatprep.subr.bf16.mxu1 %v2963_v14  ;;  %v2964_v42 = vld [vmem:[%s4048_s3 + $0x288] ss:$16 sps:$4 sm:$0xff]   ;;  %v3020_v14 = vld [vmem:[%s4048_s3 + $0x4cc] ss:$16 sps:$4 sm:$0xff]  }
  0x73   :  { %1439 = vmatpush1.bf16.msra.mxu0 %v2816_v17  ;;  %v2961_v17 = vld [vmem:[%s4048_s3 + $0x268] ss:$16 sps:$4 sm:$0xff]  }
  0x74   :  { %1440 = vmatprep.subr.bf16.mxu0 %v2822_v18  ;;  %v2966_v18 = vld [vmem:[%s4048_s3 + $0x28c] ss:$16 sps:$4 sm:$0xff]   ;;  %1640 = vmatpush1.bf16.msra.mxu1 %v2961_v17  ;;  %v3024_v17 = vld [vmem:[%s4048_s3 + $0x508] ss:$16 sps:$4 sm:$0xff]  }
  0x75   :  { %1641 = vmatprep.subr.bf16.mxu1 %v2966_v18  ;;  %v3032_v18 = vld [vmem:[%s4048_s3 + $0x54c] ss:$16 sps:$4 sm:$0xff]  }
  0x77   :  { %1441 = vmatpush1.bf16.msra.mxu0 %v2820_v21  ;;  %v2868_v21 = vld [vmem:[%s4048_s3 + $0x540] ss:$16 sps:$4 sm:$0xff]   ;;  %1613 = vmatmul.mubr.bf16.gmra.mrb[8].mxu1 %v3304_v48  ;;  %v2879_v48 = vld [vmem:[%s4048_s3 + $0x584] ss:$16 sps:$4 sm:$0xff]  }
  0x78   :  { %1442 = vmatprep.subr.bf16.mxu0 %v2827_v22  ;;  %v2873_v22 = vld [vmem:[%s4048_s3 + $0x564] ss:$16 sps:$4 sm:$0xff]   ;;  %1642 = vmatpush1.bf16.msra.mxu1 %v2964_v42  ;;  %v3033_v42 = vld [vmem:[%s4048_s3 + $0x568] ss:$16 sps:$4 sm:$0xff]  }
  0x79   :  { %1622 = vmatprep.mubr.bf16.mxu1 %v3309_v49  ;;  %1643 = vmatprep.subr.bf16.mxu1 %v2969_v20  ;;  %v2970_v49 = vld [vmem:[%s4048_s3 + $0x2c8] ss:$16 sps:$4 sm:$0xff]   ;;  %v3038_v20 = vld [vmem:[%s4048_s3 + $0x58c] ss:$16 sps:$4 sm:$0xff]  }
  0x7b   :  { %1443 = vmatpush1.bf16.msra.mxu0 %v2825_v25  ;;  %v2871_v25 = vld [vmem:[%s4048_s3 + $0x560] ss:$16 sps:$4 sm:$0xff]  }
  0x7c   :  { %1444 = vmatprep.subr.bf16.mxu0 %v2831_v26  ;;  %1644 = vmatpush1.bf16.msra.mxu1 %v2967_v23  ;;  %v2975_v26 = vld [vmem:[%s4048_s3 + $0x2ec] ss:$16 sps:$4 sm:$0xff]   ;;  %v3039_v23 = vld [vmem:[%s4048_s3 + $0x5a8] ss:$16 sps:$4 sm:$0xff]  }
  0x7d   :  { %1645 = vmatprep.subr.bf16.mxu1 %v2972_v24  ;;  %v3044_v24 = vld [vmem:[%s4048_s3 + $0x5cc] ss:$16 sps:$4 sm:$0xff]  }
  0x7f   :  { %1445 = vmatpush1.bf16.msra.mxu0 %v2829_v29  ;;  %1623 = vmatmul.mubr.bf16.gmra.mrb[12].mxu1 %v3328_v54  ;;  %v2973_v29 = vld [vmem:[%s4048_s3 + $0x2e8] ss:$16 sps:$4 sm:$0xff]   ;;  %v2888_v54 = vld [vmem:[%s4048_s3 + $0x5c4] ss:$16 sps:$4 sm:$0xff]  }
  0x80   :  { %1487 = vmatprep.subr.bf16.mxu0 %v2837_v30  ;;  %1646 = vmatpush1.bf16.msra.mxu1 %v2970_v49  ;;  %v2978_v30 = vld [vmem:[%s4048_s3 + $0x30c] ss:$16 sps:$4 sm:$0xff]   ;;  %v3045_v49 = vld [vmem:[%s4048_s3 + $0x5e8] ss:$16 sps:$4 sm:$0xff]  }
  0x81   :  { %1665 = vmatprep.mubr.bf16.mxu1 %v3336_v56  ;;  %1647 = vmatprep.subr.bf16.mxu1 %v2975_v26  ;;  %v2976_v56 = vld [vmem:[%s4048_s3 + $0x308] ss:$16 sps:$4 sm:$0xff]   ;;  %v3104_v26 = vmov 0  }
  0x82   :  { %1447 = vmatmul.mubr.bf16.vlgmr.msra.gmra.mrb[0].mxu0 %v3460_v32 }
  0x83   :  { %1488 = vmatpush1.bf16.msra.mxu0 %v2835_v35  ;;  %1456 = vmatprep.mubr.bf16.mxu0 %v3471_v37  ;;  %v2886_v35 = vld [vmem:[%s4048_s3 + $0x5c0] ss:$16 sps:$4 sm:$0xff]  }
  0x84   :  { %1489 = vmatprep.subr.bf16.mxu0 %v2840_v38  ;;  %1648 = vmatpush1.bf16.msra.mxu1 %v2973_v29  ;;  %v2891_v38 = vld [vmem:[%s4048_s3 + $0x5e4] ss:$16 sps:$4 sm:$0xff]  }
  0x85   :  { %1649 = vmatprep.subr.bf16.mxu1 %v2978_v30  ;;  %v3057_v29 = vld [vmem:[%s4051_s5 + $0x14] ss:$8 sps:$4 sm:$0xff]   ;;  %v3055_v30 = vld [vmem:[%s4051_s5 + $0x10] ss:$8 sps:$4 sm:$0xff]  }
  0x87   :  { %1490 = vmatpush1.bf16.msra.mxu0 %v2838_v43  ;;  %v2889_v43 = vld [vmem:[%s4048_s3 + $0x5e0] ss:$16 sps:$4 sm:$0xff]  }
  0x88   :  { %1491 = vmatprep.subr.bf16.mxu0 %v2843_v44  ;;  %1650 = vmatpush1.bf16.msra.mxu1 %v2976_v56  ;;  %v2982_v44 = vld [vmem:[%s4048_s3 + $0x348] ss:$16 sps:$4 sm:$0xff]   ;;  %v3063_v56 = vld [vmem:[%s4051_s5 + $0x34] ss:$8 sps:$4 sm:$0xff]  }
  0x89   :  { %1651 = vmatprep.subr.bf16.mxu1 %v2981_v33  ;;  %v3061_v33 = vld [vmem:[%s4051_s5 + $0x30] ss:$8 sps:$4 sm:$0xff]  }
  0x8a   :  { %1457 = vmatmul.mubr.bf16.gmra.mrb[4].mxu0 %v3496_v46 }
  0x8b   :  { %1492 = vmatpush1.bf16.msra.mxu0 %v2841_v50  ;;  %1466 = vmatprep.mubr.bf16.mxu0 %v3507_v51  ;;  %v3713_v50 = vld [vmem:[%s4049_s1 + $0x44] ss:$24 sps:$4 sm:$0xff]  }
  0x8c   :  { %1493 = vmatprep.subr.bf16.mxu0 %v2846_v52  ;;  %1652 = vmatpush1.bf16.msra.mxu1 %v2979_v39  ;;  %v2985_v52 = vld [vmem:[%s4048_s3 + $0x368] ss:$16 sps:$4 sm:$0xff]   ;;  %v3069_v39 = vld [vmem:[%s4051_s5 + $0x54] ss:$8 sps:$4 sm:$0xff]  }
  0x8d   :  { %1653 = vmatprep.subr.bf16.mxu1 %v2984_v41  ;;  %v3067_v41 = vld [vmem:[%s4051_s5 + $0x50] ss:$8 sps:$4 sm:$0xff]  }
  0x8f   :  { %1494 = vmatpush1.bf16.msra.mxu0 %v2844_v57  ;;  %v3729_v57 = vld [vmem:[%s4049_s1 + $0x40] ss:$24 sps:$4 sm:$0xff]  }
  0x90   :  { %1495 = vmatprep.subr.bf16.mxu0 %v2849_v58  ;;  %1654 = vmatpush1.bf16.msra.mxu1 %v2982_v44  ;;  %v2993_v58 = vld [vmem:[%s4048_s3 + $0x3ac] ss:$16 sps:$4 sm:$0xff]   ;;  %v3070_v44 = vld [vmem:[%s4051_s5 + $0x60] ss:$8 sps:$4 sm:$0xff]  }
  0x91   :  { %1655 = vmatprep.subr.bf16.mxu1 %v2987_v47  ;;  %v3073_v47 = vld [vmem:[%s4051_s5 + $0x70] ss:$8 sps:$4 sm:$0xff]  }
  0x92   :  { %1467 = vmatmul.mubr.bf16.gmra.mrb[8].mxu0 %v3532_v60 }
  0x93   :  { %1496 = vmatpush1.bf16.msra.mxu0 %v2847_v62  ;;  %1476 = vmatprep.mubr.bf16.mxu0 %v3543_v63  ;;  %v2996_v62 = vld [vmem:[%s4048_s3 + $0x3cc] ss:$16 sps:$4 sm:$0xff]  }
  0x94   :  { %1497 = vmatprep.subr.bf16.mxu0 %v2852_v0  ;;  %1656 = vmatpush1.bf16.msra.mxu1 %v2985_v52  ;;  %v2994_v0 = vld [vmem:[%s4048_s3 + $0x3c8] ss:$16 sps:$4 sm:$0xff]  }
  0x95   :  { %1657 = vmatprep.subr.bf16.mxu1 %v2990_v53  ;;  %v3076_v52 = vld [vmem:[%s4051_s5 + $0x80] ss:$8 sps:$4 sm:$0xff]   ;;  %v3081_v53 = vld [vmem:[%s4051_s5 + $0x94] ss:$8 sps:$4 sm:$0xff]  }
  0x97   :  { %1498 = vmatpush1.bf16.msra.mxu0 %v2850_v3  ;;  %v3761_v3 = vld [vmem:[%s4049_s1 + $0xa4] ss:$24 sps:$4 sm:$0xff]  }
  0x98   :  { %1499 = vmatprep.subr.bf16.mxu0 %v2855_v4  ;;  %1658 = vmatpush1.bf16.msra.mxu1 %v2988_v55  ;;  %v2997_v4 = vld [vmem:[%s4048_s3 + $0x3e8] ss:$16 sps:$4 sm:$0xff]  }
  0x99   :  { %1659 = vmatprep.subr.bf16.mxu1 %v2993_v58  ;;  %v3079_v55 = vld [vmem:[%s4051_s5 + $0x90] ss:$8 sps:$4 sm:$0xff]   ;;  %v3082_v58 = vld [vmem:[%s4051_s5 + $0xa0] ss:$8 sps:$4 sm:$0xff]  }
  0x9a   :  { %1477 = vmatmul.mubr.bf16.gmra.mrb[12].mxu0 %v3568_v6 }
  0x9b   :  { %1500 = vmatpush1.bf16.msra.mxu0 %v2853_v8  ;;  %1519 = vmatprep.mubr.bf16.mxu0 %v3579_v9  ;;  %v3777_v8 = vld [vmem:[%s4049_s1 + $0xa0] ss:$24 sps:$4 sm:$0xff]  }
  0x9c   :  { %1501 = vmatprep.subr.bf16.mxu0 %v2858_v10  ;;  %1660 = vmatpush1.bf16.msra.mxu1 %v2991_v61  ;;  %v3005_v10 = vld [vmem:[%s4048_s3 + $0x42c] ss:$16 sps:$4 sm:$0xff]   ;;  %v3085_v61 = vld [vmem:[%s4051_s5 + $0xb0] ss:$8 sps:$4 sm:$0xff]  }
  0x9d   :  { %1661 = vmatprep.subr.bf16.mxu1 %v2996_v62  ;;  %v3090_v62 = vld [vmem:[%s4051_s5 + $0xc4] ss:$8 sps:$4 sm:$0xff]  }
  0x9f   :  { %1502 = vmatpush1.bf16.msra.mxu0 %v2856_v13  ;;  %v3006_v13 = vld [vmem:[%s4048_s3 + $0x448] ss:$16 sps:$4 sm:$0xff]  }
  0xa0   :  { %1503 = vmatprep.subr.bf16.mxu0 %v2861_v34  ;;  %1662 = vmatpush1.bf16.msra.mxu1 %v2994_v0  ;;  %v3014_v34 = vld [vmem:[%s4048_s3 + $0x48c] ss:$16 sps:$4 sm:$0xff]   ;;  %v3088_v0 = vld [vmem:[%s4051_s5 + $0xc0] ss:$8 sps:$4 sm:$0xff]  }
  0xa1   :  { %1663 = vmatprep.subr.bf16.mxu1 %v2999_v2  ;;  %v3091_v2 = vld [vmem:[%s4051_s5 + $0xd0] ss:$8 sps:$4 sm:$0xff]  }
  0xa3   :  { %1504 = vmatpush1.bf16.msra.mxu0 %v2859_v15  ;;  %v3018_v15 = vld [vmem:[%s4048_s3 + $0x4c8] ss:$16 sps:$4 sm:$0xff]  }
  0xa4   :  { %1505 = vmatprep.subr.bf16.mxu0 %v2864_v16  ;;  %1664 = vmatpush1.bf16.msra.mxu1 %v2997_v4  ;;  %v3026_v16 = vld [vmem:[%s4048_s3 + $0x50c] ss:$16 sps:$4 sm:$0xff]  }
  0xa5   :  { %1706 = vmatprep.subr.bf16.mxu1 %v3002_v5 }
  0xa7   :  { %1506 = vmatpush1.bf16.msra.mxu0 %v2862_v19  ;;  %1666 = vmatmul.mubr.bf16.vlgmr.msra.gmra.mrb[0].mxu1 %v3460_v32  ;;  %v3011_v32 = vld [vmem:[%s4048_s3 + $0x46c] ss:$16 sps:$4 sm:$0xff]   ;;  %v3030_v19 = vld [vmem:[%s4048_s3 + $0x548] ss:$16 sps:$4 sm:$0xff]  }
  0xa8   :  { %1507 = vmatprep.subr.bf16.mxu0 %v2870_v40  ;;  %1707 = vmatpush1.bf16.msra.mxu1 %v3000_v7  ;;  %v3035_v40 = vld [vmem:[%s4048_s3 + $0x56c] ss:$16 sps:$4 sm:$0xff]  }
  0xa9   :  { %1675 = vmatprep.mubr.bf16.mxu1 %v3471_v37  ;;  %1708 = vmatprep.subr.bf16.mxu1 %v3005_v10  ;;  %v3009_v37 = vld [vmem:[%s4048_s3 + $0x468] ss:$16 sps:$4 sm:$0xff]  }
  0xab   :  { %1508 = vmatpush1.bf16.msra.mxu0 %v2868_v21  ;;  %v3036_v21 = vld [vmem:[%s4048_s3 + $0x588] ss:$16 sps:$4 sm:$0xff]  }
  0xac   :  { %1509 = vmatprep.subr.bf16.mxu0 %v2873_v22  ;;  %1709 = vmatpush1.bf16.msra.mxu1 %v3003_v11  ;;  %v3041_v22 = vld [vmem:[%s4048_s3 + $0x5ac] ss:$16 sps:$4 sm:$0xff]  }
  0xad   :  { %1710 = vmatprep.subr.bf16.mxu1 %v3008_v12 }
  0xaf   :  { %1510 = vmatpush1.bf16.msra.mxu0 %v2871_v25  ;;  %1676 = vmatmul.mubr.bf16.gmra.mrb[4].mxu1 %v3496_v46  ;;  %v3017_v46 = vld [vmem:[%s4048_s3 + $0x4ac] ss:$16 sps:$4 sm:$0xff]   ;;  %v3042_v25 = vld [vmem:[%s4048_s3 + $0x5c8] ss:$16 sps:$4 sm:$0xff]  }
  0xb0   :  { %1511 = vmatprep.subr.bf16.mxu0 %v2879_v48  ;;  %1711 = vmatpush1.bf16.msra.mxu1 %v3006_v13  ;;  %v3047_v48 = vld [vmem:[%s4048_s3 + $0x5ec] ss:$16 sps:$4 sm:$0xff]  }
  0xb1   :  { %1685 = vmatprep.mubr.bf16.mxu1 %v3507_v51  ;;  %1712 = vmatprep.subr.bf16.mxu1 %v3011_v32  ;;  %v3015_v51 = vld [vmem:[%s4048_s3 + $0x4a8] ss:$16 sps:$4 sm:$0xff]  }
  0xb3   :  { %1512 = vmatpush1.bf16.msra.mxu0 %v2877_v27  ;;  %v3052_v27 = vld [vmem:[%s4051_s5] ss:$8 sps:$4 sm:$0xff]  }
  0xb4   :  { %1513 = vmatprep.subr.bf16.mxu0 %v2882_v28  ;;  %1713 = vmatpush1.bf16.msra.mxu1 %v3009_v37  ;;  %v3054_v28 = vld [vmem:[%s4051_s5 + $0x4] ss:$8 sps:$4 sm:$0xff]  }
  0xb5   :  { %1714 = vmatprep.subr.bf16.mxu1 %v3014_v34 }
  0xb7   :  { %1514 = vmatpush1.bf16.msra.mxu0 %v2880_v31  ;;  %1686 = vmatmul.mubr.bf16.gmra.mrb[8].mxu1 %v3532_v60  ;;  %v3023_v60 = vld [vmem:[%s4048_s3 + $0x4ec] ss:$16 sps:$4 sm:$0xff]  }
  0xb8   :  { %1515 = vmatprep.subr.bf16.mxu0 %v2888_v54  ;;  %1715 = vmatpush1.bf16.msra.mxu1 %v3012_v36  ;;  %v3060_v31 = vld [vmem:[%s4051_s5 + $0x24] ss:$8 sps:$4 sm:$0xff]   ;;  %v3058_v54 = vld [vmem:[%s4051_s5 + $0x20] ss:$8 sps:$4 sm:$0xff]  }
  0xb9   :  { %1695 = vmatprep.mubr.bf16.mxu1 %v3543_v63  ;;  %1716 = vmatprep.subr.bf16.mxu1 %v3017_v46  ;;  %v3021_v63 = vld [vmem:[%s4048_s3 + $0x4e8] ss:$16 sps:$4 sm:$0xff]  }
  0xbb   :  { %1516 = vmatpush1.bf16.msra.mxu0 %v2886_v35  ;;  %v3066_v35 = vld [vmem:[%s4051_s5 + $0x44] ss:$8 sps:$4 sm:$0xff]  }
  0xbc   :  { %1517 = vmatprep.subr.bf16.mxu0 %v2891_v38  ;;  %1717 = vmatpush1.bf16.msra.mxu1 %v3015_v51  ;;  %v3064_v38 = vld [vmem:[%s4051_s5 + $0x40] ss:$8 sps:$4 sm:$0xff]  }
  0xbd   :  { %1718 = vmatprep.subr.bf16.mxu1 %v3020_v14 }
  0xbf   :  { %1518 = vmatpush1.bf16.msra.mxu0 %v2889_v43  ;;  %1696 = vmatmul.mubr.bf16.gmra.mrb[12].mxu1 %v3568_v6  ;;  %v3029_v6 = vld [vmem:[%s4048_s3 + $0x52c] ss:$16 sps:$4 sm:$0xff]  }
  0xc0   :  { %1719 = vmatpush1.bf16.msra.mxu1 %v3018_v15  ;;  %1738 = vmatprep.mubr.bf16.mxu1 %v3579_v9  ;;  %v3027_v9 = vld [vmem:[%s4048_s3 + $0x528] ss:$16 sps:$4 sm:$0xff]   ;;  %v3072_v43 = vld [vmem:[%s4051_s5 + $0x64] ss:$8 sps:$4 sm:$0xff]  }
  0xc1   :  { %1720 = vmatprep.subr.bf16.mxu1 %v3023_v60  ;;  %2137 = vmatprep.subr.bf16.mxu0 %v3054_v28 }
  0xc2   :  { %1520 = vmatmul.mubr.bf16.vlgmr.msra.gmra.mrb[0].mxu0 %v3705_v45 }
  0xc3   :  { %1529 = vmatprep.mubr.bf16.mxu0 %v3713_v50  ;;  %2138 = vmatpush1.bf16.msra.mxu0 %v3052_v27 }
  0xc4   :  { %1721 = vmatpush1.bf16.msra.mxu1 %v3021_v63  ;;  %2139 = vmatprep.subr.bf16.mxu0 %v3057_v29 }
  0xc5   :  { %1722 = vmatprep.subr.bf16.mxu1 %v3026_v16 }
  0xc7   :  { %2140 = vmatpush1.bf16.msra.mxu0 %v3055_v30 }
  0xc8   :  { %1723 = vmatpush1.bf16.msra.mxu1 %v3024_v17  ;;  %2141 = vmatprep.subr.bf16.mxu0 %v3060_v31 }
  0xc9   :  { %1724 = vmatprep.subr.bf16.mxu1 %v3029_v6 }
  0xca   :  { %1530 = vmatmul.mubr.bf16.gmra.mrb[4].mxu0 %v3729_v57 }
  0xcb   :  { %1539 = vmatprep.mubr.bf16.mxu0 %v3737_v59  ;;  %2142 = vmatpush1.bf16.msra.mxu0 %v3058_v54 }
  0xcc   :  { %1725 = vmatpush1.bf16.msra.mxu1 %v3027_v9  ;;  %2143 = vmatprep.subr.bf16.mxu0 %v3063_v56 }
  0xcd   :  { %1726 = vmatprep.subr.bf16.mxu1 %v3032_v18 }
  0xcf   :  { %2144 = vmatpush1.bf16.msra.mxu0 %v3061_v33 }
  0xd0   :  { %1727 = vmatpush1.bf16.msra.mxu1 %v3030_v19  ;;  %2145 = vmatprep.subr.bf16.mxu0 %v3066_v35  ;;  %v3048_v19 = vld [vmem:[%s4050_s2] sm:$0xff]  }
  0xd1   :  { %1728 = vmatprep.subr.bf16.mxu1 %v3035_v40  ;;  %v3049_v40 = vld [vmem:[%s4050_s2 + $0x8] sm:$0xff]  }
  0xd2   :  { %1540 = vmatmul.mubr.bf16.gmra.mrb[8].mxu0 %v3753_v1 }
  0xd3   :  { %1549 = vmatprep.mubr.bf16.mxu0 %v3761_v3  ;;  %2146 = vmatpush1.bf16.msra.mxu0 %v3064_v38 }
  0xd4   :  { %1729 = vmatpush1.bf16.msra.mxu1 %v3033_v42  ;;  %2147 = vmatprep.subr.bf16.mxu0 %v3069_v39  ;;  %v3050_v42 = vld [vmem:[%s4050_s2 + $0x10] sm:$0xff]  }
  0xd5   :  { %1730 = vmatprep.subr.bf16.mxu1 %v3038_v20  ;;  %v3051_v20 = vld [vmem:[%s4050_s2 + $0x18] sm:$0xff]  }
  0xd7   :  { %2148 = vmatpush1.bf16.msra.mxu0 %v3067_v41 }
  0xd8   :  { %1731 = vmatpush1.bf16.msra.mxu1 %v3036_v21  ;;  %2149 = vmatprep.subr.bf16.mxu0 %v3072_v43  ;;  %v3096_v21 = vld [vmem:[%s4051_s5 + $0xe4] ss:$8 sps:$4 sm:$0xff]  }
  0xd9   :  { %1732 = vmatprep.subr.bf16.mxu1 %v3041_v22  ;;  %v3094_v22 = vld [vmem:[%s4051_s5 + $0xe0] ss:$8 sps:$4 sm:$0xff]  }
  0xda   :  { %1550 = vmatmul.mubr.bf16.gmra.mrb[12].mxu0 %v3777_v8 }
  0xdb   :  { %2150 = vmatpush1.bf16.msra.mxu0 %v3070_v44 }
  0xdc   :  { %1733 = vmatpush1.bf16.msra.mxu1 %v3039_v23  ;;  %v3099_v23 = vld [vmem:[%s4051_s5 + $0xf4] ss:$8 sps:$4 sm:$0xff]  }
  0xdd   :  { %1734 = vmatprep.subr.bf16.mxu1 %v3044_v24  ;;  %v3097_v24 = vld [vmem:[%s4051_s5 + $0xf0] ss:$8 sps:$4 sm:$0xff]  }
  0xe0   :  { %1735 = vmatpush1.bf16.msra.mxu1 %v3042_v25  ;;  %v1895_v25 = vlaneseq }
  0xe1   :  { %1736 = vmatprep.subr.bf16.mxu1 %v3047_v48 }
  0xe2   :  { %v1896_v48 = vshrl.u32 %v1895_v25, 7 }
  0xe4   :  { %1737 = vmatpush1.bf16.msra.mxu1 %v3045_v49  ;;  %v1897_v49 = vsub.s32 0, %v1896_v48  ;;  %v1901_v27 = vsub.s32 1, %v1896_v48 }
  0xe7   :  { %1739 = vmatmul.mubr.bf16.vlgmr.msra.gmra.mrb[0].mxu1 %v3705_v45  ;;  %v3075_v45 = vld [vmem:[%s4051_s5 + $0x74] ss:$8 sps:$4 sm:$0xff]  }
  0xe8   :  { %1748 = vmatprep.mubr.bf16.mxu1 %v3713_v50  ;;  %2151 = vmatprep.subr.bf16.mxu0 %v3075_v45  ;;  %v3078_v50 = vld [vmem:[%s4051_s5 + $0x84] ss:$8 sps:$4 sm:$0xff]  }
  0xe9   :  { %2152 = vmatpush1.bf16.msra.mxu0 %v3073_v47 }
  0xea   :  { %2153 = vmatprep.subr.bf16.mxu0 %v3078_v50 }
  0xed   :  { %2154 = vmatpush1.bf16.msra.mxu0 %v3076_v52 }
  0xee   :  { %2155 = vmatprep.subr.bf16.mxu0 %v3081_v53 }
  0xef   :  { %1749 = vmatmul.mubr.bf16.gmra.mrb[4].mxu1 %v3729_v57  ;;  %v3084_v57 = vld [vmem:[%s4051_s5 + $0xa4] ss:$8 sps:$4 sm:$0xff]  }
  0xf0   :  { %1758 = vmatprep.mubr.bf16.mxu1 %v3737_v59  ;;  %v3087_v59 = vld [vmem:[%s4051_s5 + $0xb4] ss:$8 sps:$4 sm:$0xff]  }
  0xf1   :  { %2156 = vmatpush1.bf16.msra.mxu0 %v3079_v55 }
  0xf2   :  { %2157 = vmatprep.subr.bf16.mxu0 %v3084_v57 }
  0xf5   :  { %2158 = vmatpush1.bf16.msra.mxu0 %v3082_v58 }
  0xf6   :  { %2159 = vmatprep.subr.bf16.mxu0 %v3087_v59 }
  0xf7   :  { %1759 = vmatmul.mubr.bf16.gmra.mrb[8].mxu1 %v3753_v1  ;;  %v3093_v1 = vld [vmem:[%s4051_s5 + $0xd4] ss:$8 sps:$4 sm:$0xff]  }
  0xf8   :  { %1768 = vmatprep.mubr.bf16.mxu1 %v3761_v3 }
  0xf9   :  { %2160 = vmatpush1.bf16.msra.mxu0 %v3085_v61 }
  0xfa   :  { %2161 = vmatprep.subr.bf16.mxu0 %v3090_v62 }
  0xfd   :  { %2162 = vmatpush1.bf16.msra.mxu0 %v3088_v0 }
  0xfe   :  { %2163 = vmatprep.subr.bf16.mxu0 %v3093_v1 }
  0xff   :  { %1769 = vmatmul.mubr.bf16.gmra.mrb[12].mxu1 %v3777_v8 }
 0x100   :  { %1852 = vmatprep.mubr.bf16.mxu1 %v3104_v26 }
 0x101   :  { %2164 = vmatpush1.bf16.msra.mxu0 %v3091_v2 }
 0x102   :  { %2165 = vmatprep.subr.bf16.mxu0 %v3096_v21 }
 0x105   :  { %2166 = vmatpush1.bf16.msra.mxu0 %v3094_v22 }
 0x106   :  { %2167 = vmatprep.subr.bf16.mxu0 %v3099_v23 }
 0x109   :  { %2168 = vmatpush1.bf16.msra.mxu0 %v3097_v24  ;;  %v3100_v24 = vld [vmem:[%s4050_s2 + $0x20] sm:$0xff]  }
 0x195   :  { %v1521_v3 = vpop.f32.mrb[0].mxu0 }
 0x196   :  { %v1523_v4 = vpop.f32.mrb[1].mxu0 }
 0x197   :  { %v1525_v5 = vpop.f32.mrb[2].mxu0 }
 0x198   :  { %v1779_v7 = vpack.c.bf16 %v1525_v5, %v1521_v3  ;;  %v1527_v8 = vpop.f32.mrb[3].mxu0 }
 0x199   :  { %v1780_v10 = vpack.c.bf16 %v1527_v8, %v1523_v4 }
 0x19b   :  { %1820 = vmatprep.subr.bf16.mxu1 %v1780_v10 }
 0x19c   :  { %1821 = vmatpush1.bf16.msra.mxu1 %v1779_v7 }
 0x19d   :  { %v1531_v11 = vpop.f32.mrb[4].mxu0 }
 0x19e   :  { %v1533_v12 = vpop.f32.mrb[5].mxu0 }
 0x19f   :  { %v1535_v13 = vpop.f32.mrb[6].mxu0 }
 0x1a0   :  { %v1781_v32 = vpack.c.bf16 %v1535_v13, %v1531_v11  ;;  %v1537_v37 = vpop.f32.mrb[7].mxu0 }
 0x1a1   :  { %v1782_v34 = vpack.c.bf16 %v1537_v37, %v1533_v12 }
 0x1a3   :  { %1822 = vmatprep.subr.bf16.mxu1 %v1782_v34 }
 0x1a4   :  { %1823 = vmatpush1.bf16.msra.mxu1 %v1781_v32 }
 0x1a5   :  { %v1541_v36 = vpop.f32.mrb[8].mxu0 }
 0x1a6   :  { %v1543_v46 = vpop.f32.mrb[9].mxu0 }
 0x1a7   :  { %v1545_v51 = vpop.f32.mrb[10].mxu0 }
 0x1a8   :  { %v1783_v14 = vpack.c.bf16 %v1545_v51, %v1541_v36  ;;  %v1547_v15 = vpop.f32.mrb[11].mxu0 }
 0x1a9   :  { %v1784_v60 = vpack.c.bf16 %v1547_v15, %v1543_v46 }
 0x1ab   :  { %1824 = vmatprep.subr.bf16.mxu1 %v1784_v60 }
 0x1ac   :  { %1825 = vmatpush1.bf16.msra.mxu1 %v1783_v14 }
 0x1ad   :  { %v1551_v63 = vpop.f32.mrb[12].mxu0 }
 0x1ae   :  { %v1553_v16 = vpop.f32.mrb[13].mxu0 }
 0x1af   :  { %v1555_v17 = vpop.f32.mrb[14].mxu0 }
 0x1b0   :  { %v1785_v6 = vpack.c.bf16 %v1555_v17, %v1551_v63  ;;  %v1557_v9 = vpop.f32.mrb[15].mxu0 }
 0x1b1   :  { %v1786_v18 = vpack.c.bf16 %v1557_v9, %v1553_v16 }
 0x1b3   :  { %1826 = vmatprep.subr.bf16.mxu1 %v1786_v18 }
 0x1b4   :  { %1827 = vmatpush1.bf16.msra.mxu1 %v1785_v6 }
 0x1b7   :  { %2574 = vmatmul.mubr.msk.bf16.vlgmr.msra.gmra.mrb[0].mxu1 %vm1807_vm0, %v3048_v19 }
 0x1b8   :  { %1862 = vmatprep.mubr.bf16.mxu1 %v3104_v26 }
 0x1bf   :  { %2575 = vmatmul.mubr.msk.bf16.gmra.mrb[4].mxu1 %vm1807_vm0, %v3049_v40 }
 0x1c0   :  { %1872 = vmatprep.mubr.bf16.mxu1 %v3104_v26 }
 0x1c7   :  { %2576 = vmatmul.mubr.msk.bf16.gmra.mrb[8].mxu1 %vm1807_vm0, %v3050_v42 }
 0x1c8   :  { %1882 = vmatprep.mubr.bf16.mxu1 %v3104_v26  ;;  %v1893_v26 = vld [vmem:[%s4052_s4] sm:$0x3] }
 0x1c9   :  { %v1898_v28 = vrot.slane %v1893_v26, %v1897_v49  ;;  %v1902_v29 = vrot.slane %v1893_v26, %v1901_v27 }
 0x1cf   :  { %2577 = vmatmul.mubr.msk.bf16.gmra.mrb[12].mxu1 %vm1807_vm0, %v3051_v20 }
 0x1d0   :  { %2635 = vmatprep.mubr.msk.bf16.mxu1 %vm1807_vm0, %v3100_v24 }
 0x28a   :  { %v1854_v30 = vpop.f32.mrb[0].mxu1 }
 0x28b   :  { %v1905_v31 = vadd.f32 %v1898_v28, %v1854_v30  ;;  %v1856_v54 = vpop.f32.mrb[1].mxu1 }
 0x28c   :  { %v1906_v56 = vadd.f32 %v1902_v29, %v1856_v54  ;;  %v1858_v33 = vpop.f32.mrb[2].mxu1 }
 0x28d   :  { %v1907_v35 = vadd.f32 %v1898_v28, %v1858_v33  ;;  %v1860_v38 = vpop.f32.mrb[3].mxu1  ;;  %v1921_v41 = vmax.f32 %v1905_v31, 0.0 }
 0x28e   :  { %v1908_v39 = vadd.f32 %v1902_v29, %v1860_v38  ;;  %v1922_v44 = vmax.f32 %v1906_v56, 0.0 }
 0x28f   :  { %v1923_v43 = vmax.f32 %v1907_v35, 0.0 }
 0x290   :  { %v1924_v45 = vmax.f32 %v1908_v39, 0.0 }
 0x291   :  { %v1937_v47 = vpack.c.bf16 %v1923_v43, %v1921_v41 }
 0x292   :  { %v1938_v50 = vpack.c.bf16 %v1924_v45, %v1922_v44  ;;  %v1864_v52 = vpop.f32.mrb[4].mxu1 }
 0x293   :  { %v1909_v53 = vadd.f32 %v1898_v28, %v1864_v52  ;;  %v1866_v55 = vpop.f32.mrb[5].mxu1  ;;  %v3102_v52 = vld [vmem:[%s4050_s2 + $0x30] sm:$0xff]  }
 0x294   :  { %v1910_v57 = vadd.f32 %v1902_v29, %v1866_v55  ;;  %v1868_v58 = vpop.f32.mrb[6].mxu1  ;;  %2169 = vmatprep.mubr.bf16.mxu0 %v1938_v50  ;;  %v3101_v50 = vld [vmem:[%s4050_s2 + $0x28] sm:$0xff]  }
 0x295   :  { %v1911_v59 = vadd.f32 %v1898_v28, %v1868_v58  ;;  %v1870_v61 = vpop.f32.mrb[7].mxu1  ;;  %2170 = vmatmul.mubr.bf16.vlgmr.msra.gmra.mrb[16].mxu0 %v1937_v47  ;;  %v1925_v0 = vmax.f32 %v1909_v53, 0.0  ;;  %v3103_v53 = vld [vmem:[%s4050_s2 + $0x38] sm:$0xff]  }
 0x296   :  { %v1912_v62 = vadd.f32 %v1902_v29, %v1870_v61  ;;  %v1926_v2 = vmax.f32 %v1910_v57, 0.0  ;;  %v2618_v57 = vld [vmem:[%s4053_s6] ss:$0 sm:$0xff] }
 0x297   :  { %v1927_v1 = vmax.f32 %v1911_v59, 0.0 }
 0x298   :  { %v1928_v3 = vmax.f32 %v1912_v62, 0.0 }
 0x299   :  { %v1939_v4 = vpack.c.bf16 %v1927_v1, %v1925_v0 }
 0x29a   :  { %v1940_v5 = vpack.c.bf16 %v1928_v3, %v1926_v2  ;;  %v1874_v7 = vpop.f32.mrb[8].mxu1 }
 0x29b   :  { %v1913_v8 = vadd.f32 %v1898_v28, %v1874_v7  ;;  %v1876_v10 = vpop.f32.mrb[9].mxu1 }
 0x29c   :  { %v1914_v11 = vadd.f32 %v1902_v29, %v1876_v10  ;;  %v1878_v12 = vpop.f32.mrb[10].mxu1  ;;  %2179 = vmatprep.mubr.bf16.mxu0 %v1940_v5 }
 0x29d   :  { %v1915_v13 = vadd.f32 %v1898_v28, %v1878_v12  ;;  %v1880_v32 = vpop.f32.mrb[11].mxu1  ;;  %2180 = vmatmul.mubr.bf16.gmra.mrb[20].mxu0 %v1939_v4  ;;  %v1929_v34 = vmax.f32 %v1913_v8, 0.0 }
 0x29e   :  { %v1916_v37 = vadd.f32 %v1902_v29, %v1880_v32  ;;  %v1930_v46 = vmax.f32 %v1914_v11, 0.0 }
 0x29f   :  { %v1931_v36 = vmax.f32 %v1915_v13, 0.0 }
 0x2a0   :  { %v1932_v51 = vmax.f32 %v1916_v37, 0.0 }
 0x2a1   :  { %v1941_v14 = vpack.c.bf16 %v1931_v36, %v1929_v34 }
 0x2a2   :  { %v1942_v15 = vpack.c.bf16 %v1932_v51, %v1930_v46  ;;  %v1884_v60 = vpop.f32.mrb[12].mxu1 }
 0x2a3   :  { %v1917_v63 = vadd.f32 %v1898_v28, %v1884_v60  ;;  %v1886_v16 = vpop.f32.mrb[13].mxu1 }
 0x2a4   :  { %v1918_v17 = vadd.f32 %v1902_v29, %v1886_v16  ;;  %v1888_v6 = vpop.f32.mrb[14].mxu1  ;;  %2189 = vmatprep.mubr.bf16.mxu0 %v1942_v15 }
 0x2a5   :  { %v1919_v9 = vadd.f32 %v1898_v28, %v1888_v6  ;;  %v1890_v18 = vpop.f32.mrb[15].mxu1  ;;  %2190 = vmatmul.mubr.bf16.gmra.mrb[24].mxu0 %v1941_v14  ;;  %v1933_v40 = vmax.f32 %v1917_v63, 0.0 }
 0x2a6   :  { %v1920_v19 = vadd.f32 %v1902_v29, %v1890_v18  ;;  %v1934_v20 = vmax.f32 %v1918_v17, 0.0 }
 0x2a7   :  { %v1935_v42 = vmax.f32 %v1919_v9, 0.0 }
 0x2a8   :  { %v1936_v21 = vmax.f32 %v1920_v19, 0.0 }
 0x2a9   :  { %v1943_v22 = vpack.c.bf16 %v1935_v42, %v1933_v40 }
 0x2aa   :  { %v1944_v23 = vpack.c.bf16 %v1936_v21, %v1934_v20 }
 0x2ac   :  { %2199 = vmatprep.mubr.bf16.mxu0 %v1944_v23 }
 0x2ad   :  { %2200 = vmatmul.mubr.bf16.gmra.mrb[28].mxu0 %v1943_v22 }
 0x368   :  { %v2171_v25 = vpop.f32.mrb[16].mxu0 }
 0x369   :  { %v2173_v48 = vpop.f32.mrb[17].mxu0 }
 0x36a   :  { %v2175_v49 = vpop.f32.mrb[18].mxu0 }
 0x36b   :  { %v2210_v26 = vpack.c.bf16 %v2175_v49, %v2171_v25  ;;  %v2177_v27 = vpop.f32.mrb[19].mxu0 }
 0x36d   :  { %2627 = vmatprep.subr.bf16.mxu1 %v2210_v26 }
 0x36e   :  { %2628 = vmatpush3.bf16.msra.mxu1 %v2210_v26 }
 0x370   :  { %v2181_v28 = vpop.f32.mrb[20].mxu0 }
 0x371   :  { %v2183_v29 = vpop.f32.mrb[21].mxu0 }
 0x372   :  { %v2185_v30 = vpop.f32.mrb[22].mxu0 }
 0x373   :  { %v2211_v31 = vpack.c.bf16 %v2185_v30, %v2181_v28  ;;  %v2187_v54 = vpop.f32.mrb[23].mxu0 }
 0x375   :  { %2629 = vmatprep.subr.bf16.mxu1 %v2211_v31 }
 0x376   :  { %2630 = vmatpush3.bf16.msra.mxu1 %v2211_v31 }
 0x378   :  { %v2191_v56 = vpop.f32.mrb[24].mxu0 }
 0x379   :  { %v2193_v33 = vpop.f32.mrb[25].mxu0 }
 0x37a   :  { %v2195_v35 = vpop.f32.mrb[26].mxu0 }
 0x37b   :  { %v2212_v38 = vpack.c.bf16 %v2195_v35, %v2191_v56  ;;  %v2197_v39 = vpop.f32.mrb[27].mxu0 }
 0x37d   :  { %2631 = vmatprep.subr.bf16.mxu1 %v2212_v38 }
 0x37e   :  { %2632 = vmatpush3.bf16.msra.mxu1 %v2212_v38 }
 0x380   :  { %v2201_v41 = vpop.f32.mrb[28].mxu0 }
 0x381   :  { %v2203_v43 = vpop.f32.mrb[29].mxu0 }
 0x382   :  { %v2205_v44 = vpop.f32.mrb[30].mxu0 }
 0x383   :  { %v2213_v45 = vpack.c.bf16 %v2205_v44, %v2201_v41  ;;  %v2207_v47 = vpop.f32.mrb[31].mxu0 }
 0x385   :  { %2633 = vmatprep.subr.bf16.mxu1 %v2213_v45 }
 0x386   :  { %2634 = vmatpush3.bf16.msra.mxu1 %v2213_v45 }
 0x389   :  { %2636 = vmatmul.mubr.msk.bf16.vlgmr.msra.gmra.mrb[16].mxu1 %vm1807_vm0, %v3101_v50 }
 0x38a   :  { %2639 = vmatprep.mubr.msk.bf16.mxu1 %vm1807_vm0, %v3102_v52 }
 0x391   :  { %2640 = vmatmul.mubr.msk.bf16.gmra.mrb[20].mxu1 %vm1807_vm0, %v3103_v53 }
 0x45c   :  { %v2637_v55 = vpop.f32.mrb[16].mxu1 }
 0x45d   :  { %v2289_v58 = vadd.f32 %v2637_v55, %v2183_v29  ;;  %v2280_v59 = vpop.f32.mrb[17].mxu1 }
 0x45e   :  { %v2281_v61 = vadd.f32 %v2280_v59, %v2173_v48  ;;  %v2638_v62 = vpop.f32.mrb[18].mxu1 }
 0x45f   :  { %v2320_v0 = vadd.f32 %v2618_v57, %v2289_v58  ;;  %v2292_v1 = vadd.f32 %v2638_v62, %v2187_v54  ;;  %v2283_v2 = vpop.f32.mrb[19].mxu1 }
 0x460   :  { %v2318_v3 = vadd.f32 %v2618_v57, %v2281_v61  ;;  %v2284_v4 = vadd.f32 %v2283_v2, %v2177_v27 }
 0x461   :  { %v2328_v5 = vmax.f32 %v2320_v0, 0.0  ;;  %v2321_v7 = vadd.f32 %v2618_v57, %v2292_v1 }
 0x462   :  { %v2326_v8 = vmax.f32 %v2318_v3, 0.0  ;;  %v2319_v10 = vadd.f32 %v2618_v57, %v2284_v4 }
 0x463   :  { %2336 = vst [vmem:[%s4054_s7 + $0x10] sm:$0xff] %v2328_v5  ;;  %v2329_v11 = vmax.f32 %v2321_v7, 0.0 }
 0x464   :  { %2334 = vst [vmem:[%s4054_s7] sm:$0xff] %v2326_v8  ;;  %v2327_v12 = vmax.f32 %v2319_v10, 0.0  ;;  %v2641_v13 = vpop.f32.mrb[20].mxu1 }
 0x465   :  { %2337 = vst [vmem:[%s4054_s7 + $0x18] sm:$0xff] %v2329_v11  ;;  %v2305_v32 = vadd.f32 %v2641_v13, %v2203_v43  ;;  %v2296_v37 = vpop.f32.mrb[21].mxu1 }
 0x466   :  { %2335 = vst [vmem:[%s4054_s7 + $0x8] sm:$0xff] %v2327_v12  ;;  %v2297_v34 = vadd.f32 %v2296_v37, %v2193_v33  ;;  %v2642_v36 = vpop.f32.mrb[22].mxu1 }
 0x467   :  { %v2324_v46 = vadd.f32 %v2618_v57, %v2305_v32  ;;  %v2308_v51 = vadd.f32 %v2642_v36, %v2207_v47  ;;  %v2299_v14 = vpop.f32.mrb[23].mxu1 }
 0x468   :  { %v2322_v15 = vadd.f32 %v2618_v57, %v2297_v34  ;;  %v2300_v60 = vadd.f32 %v2299_v14, %v2197_v39 }
 0x469   :  { %v2332_v63 = vmax.f32 %v2324_v46, 0.0  ;;  %v2325_v16 = vadd.f32 %v2618_v57, %v2308_v51 }
 0x46a   :  { %v2330_v17 = vmax.f32 %v2322_v15, 0.0  ;;  %v2323_v6 = vadd.f32 %v2618_v57, %v2300_v60 }
 0x46b   :  { %2340 = vst [vmem:[%s4054_s7 + $0x30] sm:$0xff] %v2332_v63  ;;  %v2333_v9 = vmax.f32 %v2325_v16, 0.0 }
 0x46c   :  { %2338 = vst [vmem:[%s4054_s7 + $0x20] sm:$0xff] %v2330_v17  ;;  %v2331_v18 = vmax.f32 %v2323_v6, 0.0 }
 0x46d   :  { %2341 = vst [vmem:[%s4054_s7 + $0x38] sm:$0xff] %v2333_v9 }
 0x46e   :  { %2339 = vst [vmem:[%s4054_s7 + $0x28] sm:$0xff] %v2331_v18 }

</bundles_post_ra>
